<compile_context>
chip_gen: v7x
topology: tpu7x:2x2x1
jax: 0.10.0
libtpu: 0.0.40
codegen_flags: <defaults>
</compile_context>

<pallas_src>
import functools
import math

import jax
import jax.numpy as jnp
from jax.experimental import pallas as pl
from jax.experimental.pallas import tpu as pltpu


def _cross_attention_kernel(
    x_ref, ctx_ref, mask_ref,
    wq_ref, wkv_ref, bq_ref, bkv_ref,
    wo_ref, bo_ref, gamma_ref, beta_ref,
    out_ref,
    o_scratch,
    *, num_heads: int, eps: float,
):
    x = x_ref[0]                                     # (L, E) f32 (exact residual)
    L, E = x.shape
    H = num_heads
    D = E // H

    x_bf = x.astype(jnp.bfloat16)
    ctx_bf = ctx_ref[0]                              # (S, E) bf16 (cast on host)
    mask = mask_ref[...].astype(jnp.float32)         # (L, S) f32 for the score add

    # ---- fused, lane-dense projections (bf16 MXU operands, f32 accumulation) ----
    # Q: one (L,E)x(E,E) matmul; softmax scale already folded into wq/bq on the host.
    q = jnp.dot(x_bf, wq_ref[...], preferred_element_type=jnp.float32) + bq_ref[...]
    # K and V fused into one (S,E)x(E,2E) matmul; K occupies lanes [0,E), V lanes [E,2E).
    kv = jnp.dot(ctx_bf, wkv_ref[...], preferred_element_type=jnp.float32) + bkv_ref[...]

    # ---- per-head attention (static unroll; only 2-D dots, no transposes) --------
    # TODO(synk): flash-style S-tiling with online softmax for production S (see header).
    for h in range(H):
        lo = h * D
        q_h = q[:, lo:lo + D].astype(jnp.bfloat16)           # (L, D)
        k_h = kv[:, lo:lo + D].astype(jnp.bfloat16)           # (S, D)
        v_h = kv[:, E + lo:E + lo + D].astype(jnp.bfloat16)   # (S, D)

        # Scores: contraction over D, output (L, S) is lane-dense in S.
        s = jnp.einsum("ld,sd->ls", q_h, k_h,
                       preferred_element_type=jnp.float32)
        s = s + mask
        s = s - jnp.max(s, axis=-1, keepdims=True)
        p = jnp.exp(s)
        # approx reciprocal runs on the otherwise-idle EUP slot (~1e-3 relative).
        p = p * pl.reciprocal(jnp.sum(p, axis=-1, keepdims=True), approx=True)

        o_h = jnp.dot(p.astype(jnp.bfloat16), v_h,
                      preferred_element_type=jnp.float32)     # (L, D) f32
        # Assemble the per-head result into its lane slab of the (L, E) scratch:
        # this is the "concat(heads)" of torch, done as cheap slab stores.
        o_scratch[:, lo:lo + D] = o_h

    # ---- output projection: ONE lane-dense (L,E)x(E,E) matmul --------------------
    # Head reduction happens inside the MXU accumulator; no (H,L,E) intermediate.
    y = jnp.dot(o_scratch[...].astype(jnp.bfloat16), wo_ref[...],
                preferred_element_type=jnp.float32)
    y = y + bo_ref[...] + x                                   # bias + exact-f32 residual

    # ---- LayerNorm over last dim (f32) --------------------------------------------
    mu = jnp.mean(y, axis=-1, keepdims=True)
    var = jnp.mean(jnp.square(y - mu), axis=-1, keepdims=True)
    y = (y - mu) * jax.lax.rsqrt(var + eps)
    out_ref[0] = y * gamma_ref[...] + beta_ref[...]


def _repack_params(params, num_heads):
    """Host-side (XLA, loop-invariant) weight repack.

    torch linear is y = x @ W^T + b with W: (E_out, E_in).  We pre-transpose so the
    kernel never transposes, fold the 1/sqrt(D) softmax scale into Wq/bq, fuse the K
    and V projections along the output dim, and store all MXU weights as bf16.
    """
    E = params["wq"].shape[0]
    D = E // num_heads
    scale = 1.0 / math.sqrt(D)
    return {
        "wq": (params["wq"].T * scale).astype(jnp.bfloat16),          # (E, E)
        "wkv": jnp.concatenate([params["wk"].T, params["wv"].T],
                               axis=1).astype(jnp.bfloat16),           # (E, 2E)
        "bq": (params["bq"] * scale).astype(jnp.float32),              # (1, E)
        "bkv": jnp.concatenate([params["bk"], params["bv"]],
                               axis=1).astype(jnp.float32),            # (1, 2E)
        "wo": params["wo"].T.astype(jnp.bfloat16),                     # (E, E)
        "bo": params["bo"].astype(jnp.float32),                        # (1, E)
        "gamma": params["gamma"].astype(jnp.float32),                  # (1, E)
        "beta": params["beta"].astype(jnp.float32),                    # (1, E)
    }


def _vmem_limit_bytes():
    """Generation-aware VMEM limit (v5e/v6e: 128 MiB physical, v7x: 64 MiB)."""
    default_cap = 64 * 1024 * 1024
    try:
        info = pltpu.get_tpu_info()
        cap = int(getattr(info, "vmem_capacity_bytes", default_cap))
    except Exception:
        cap = default_cap
    # ~75% of physical, capped at 100 MiB, floor at 32 MiB.
    return max(32 * 1024 * 1024, min((cap * 3) // 4, 100 * 1024 * 1024))


def cross_attention(x, context, attn_mask, params, *, num_heads: int, eps: float = 1e-5):
    """x: (B, L, E) f32, context: (B, S, E) f32, attn_mask: (L, S) additive float mask."""
    B, L, E = x.shape
    S = context.shape[1]
    assert E % num_heads == 0

    rp = _repack_params(params, num_heads)
    ctx_bf = context.astype(jnp.bfloat16)     # only used as an MXU operand
    mask_bf = attn_mask.astype(jnp.bfloat16)  # -1e9 is representable in bf16

    kernel = functools.partial(_cross_attention_kernel, num_heads=num_heads, eps=eps)

    def build(single_buffer_invariants):
        inv = {"pipeline_mode": pl.Buffered(1)} if single_buffer_invariants else {}

        def const(shape):
            return pl.BlockSpec(shape, lambda b, _n=len(shape): (0,) * _n, **inv)

        return pl.pallas_call(
            kernel,
            out_shape=jax.ShapeDtypeStruct((B, L, E), jnp.float32),
            grid_spec=pltpu.PrefetchScalarGridSpec(
                num_scalar_prefetch=0,
                grid=(B,),
                in_specs=[
                    pl.BlockSpec((1, L, E), lambda b: (b, 0, 0)),   # x (f32)
                    pl.BlockSpec((1, S, E), lambda b: (b, 0, 0)),   # context (bf16)
                    const((L, S)),                                  # attn_mask (bf16)
                    const((E, E)),                                  # Wq^T * scale (bf16)
                    const((E, 2 * E)),                              # [Wk^T | Wv^T] (bf16)
                    const((1, E)),                                  # bq * scale (f32)
                    const((1, 2 * E)),                              # [bk | bv] (f32)
                    const((E, E)),                                  # Wo^T (bf16)
                    const((1, E)),                                  # bo
                    const((1, E)),                                  # ln gamma
                    const((1, E)),                                  # ln beta
                ],
                out_specs=pl.BlockSpec((1, L, E), lambda b: (b, 0, 0)),
                scratch_shapes=[pltpu.VMEM((L, E), jnp.float32)],   # per-head concat slab
            ),
            compiler_params=pltpu.CompilerParams(
                dimension_semantics=("parallel",),        # batch shards across TCs
                vmem_limit_bytes=_vmem_limit_bytes(),
            ),
        )

    args = (x, ctx_bf, mask_bf, rp["wq"], rp["wkv"], rp["bq"], rp["bkv"],
            rp["wo"], rp["bo"], rp["gamma"], rp["beta"])
    try:
        return build(True)(*args)
    except Exception:
        # Fallback: default double-buffering if this jax build rejects Buffered(1).
        return build(False)(*args)


# ----------------------------------------------------------------------------------
# References
# ----------------------------------------------------------------------------------
def _reference_f32(x, context, attn_mask, params, num_heads, eps=1e-5):
    """Pure-f32 reference mirroring torch.nn.MultiheadAttention (eval) + residual + LN."""
    B, L, E = x.shape
    S = context.shape[1]
    D = E // num_heads

    q = jnp.einsum("ble,fe->blf", x, params["wq"]) + params["bq"][0]
    k = jnp.einsum("bse,fe->bsf", context, params["wk"]) + params["bk"][0]
    v = jnp.einsum("bse,fe->bsf", context, params["wv"]) + params["bv"][0]

    q = q.reshape(B, L, num_heads, D).transpose(0, 2, 1, 3)
    k = k.reshape(B, S, num_heads, D).transpose(0, 2, 1, 3)
    v = v.reshape(B, S, num_heads, D).transpose(0, 2, 1, 3)

    s = jnp.einsum("bhld,bhsd->bhls", q, k) / math.sqrt(D) + attn_mask[None, None]
    p = jax.nn.softmax(s, axis=-1)
    o = jnp.einsum("bhls,bhsd->bhld", p, v).transpose(0, 2, 1, 3).reshape(B, L, E)

    y = jnp.einsum("ble,fe->blf", o, params["wo"]) + params["bo"][0] + x
    mu = jnp.mean(y, axis=-1, keepdims=True)
    var = jnp.mean(jnp.square(y - mu), axis=-1, keepdims=True)
    return (y - mu) * jax.lax.rsqrt(var + eps) * params["gamma"][0] + params["beta"][0]


def _reference_bf16_mxu(x, context, attn_mask, params, num_heads, eps=1e-5):
    """Mirrors the kernel numerics (bf16 MXU operands, f32 accumulation/softmax,
    exact divide instead of the EUP approx reciprocal) for a tight correctness check."""
    B, L, E = x.shape
    H = num_heads
    D = E // H
    rp = _repack_params(params, H)
    bf = jnp.bfloat16

    xb = x.astype(bf)
    cb = context.astype(bf)
    mask = attn_mask.astype(bf).astype(jnp.float32)

    q = jnp.einsum("ble,ef->blf", xb, rp["wq"],
                   preferred_element_type=jnp.float32) + rp["bq"]
    kv = jnp.einsum("bse,ef->bsf", cb, rp["wkv"],
                    preferred_element_type=jnp.float32) + rp["bkv"]

    outs = []
    for h in range(H):
        lo = h * D
        qh = q[:, :, lo:lo + D].astype(bf)
        kh = kv[:, :, lo:lo + D].astype(bf)
        vh = kv[:, :, E + lo:E + lo + D].astype(bf)
        s = jnp.einsum("bld,bsd->bls", qh, kh,
                       preferred_element_type=jnp.float32) + mask[None]
        p = jax.nn.softmax(s, axis=-1)
        outs.append(jnp.einsum("bls,bsd->bld", p.astype(bf), vh,
                               preferred_element_type=jnp.float32))
    o = jnp.concatenate(outs, axis=-1).astype(bf)              # (B, L, E)

    y = jnp.einsum("ble,ef->blf", o, rp["wo"],
                   preferred_element_type=jnp.float32) + rp["bo"] + x
    mu = jnp.mean(y, axis=-1, keepdims=True)
    var = jnp.mean(jnp.square(y - mu), axis=-1, keepdims=True)
    return (y - mu) * jax.lax.rsqrt(var + eps) * rp["gamma"] + rp["beta"]


if __name__ == "__main__":
    # Small shapes consistent with the module's forward.
    B, L, S, E, H = 2, 8, 16, 32, 4
    dropout_rate = 0.1  # inactive in eval-mode forward

    key = jax.random.PRNGKey(0)
    keys = jax.random.split(key, 12)

    def init_w(k, shape, fan_in):
        return (jax.random.normal(k, shape, jnp.float32) / math.sqrt(fan_in)).astype(jnp.float32)

    params = {
        "wq": init_w(keys[0], (E, E), E),
        "wk": init_w(keys[1], (E, E), E),
        "wv": init_w(keys[2], (E, E), E),
        "bq": 0.01 * jax.random.normal(keys[3], (1, E), jnp.float32),
        "bk": 0.01 * jax.random.normal(keys[4], (1, E), jnp.float32),
        "bv": 0.01 * jax.random.normal(keys[5], (1, E), jnp.float32),
        "wo": init_w(keys[6], (E, E), E),
        "bo": 0.01 * jax.random.normal(keys[7], (1, E), jnp.float32),
        "gamma": jnp.ones((1, E), jnp.float32),
        "beta": jnp.zeros((1, E), jnp.float32),
    }

    x = jax.random.normal(keys[8], (B, L, E), jnp.float32)
    context = jax.random.normal(keys[9], (B, S, E), jnp.float32)
    # Additive float attention mask (L, S): mask ~25% of key positions.
    mask_bits = jax.random.bernoulli(keys[10], 0.25, (L, S))
    attn_mask = jnp.where(mask_bits, -1e9, 0.0).astype(jnp.float32)
    # Guarantee no fully-masked query row (torch would NaN on such rows).
    attn_mask = attn_mask.at[:, 0].set(0.0)

    out = cross_attention(x, context, attn_mask, params, num_heads=H)
    out = jax.block_until_ready(out)
    assert out.shape == (B, L, E)
    assert not bool(jnp.any(jnp.isnan(out)))

    # Tight check against a reference that mirrors the kernel's bf16-MXU / f32-softmax
    # numerics (residual difference is dominated by the EUP approx reciprocal, ~1e-3).
    ref_matched = _reference_bf16_mxu(x, context, attn_mask, params, H)
    assert jnp.allclose(out, ref_matched, atol=5e-3, rtol=5e-3), \
        "Pallas kernel mismatch vs bf16-MXU-matched reference"

    # Looser check against the pure-f32 torch-parity reference; the gap is the expected
    # cost of bf16 MXU operands (per the performance review) + approx reciprocal.
    ref_f32 = _reference_f32(x, context, attn_mask, params, H)
    assert jnp.allclose(out, ref_f32, atol=5e-2, rtol=5e-2), \
        "Pallas kernel mismatch vs f32 torch-parity reference"

    print("KERNEL_OK")
</pallas_src>

<mosaic_0001>
module attributes {stable_mosaic.version = 11 : i64} {
  func.func @_cross_attention_kernel(%arg0: i32, %arg1: memref<1x8x32xf32, #tpu.memory_space<vmem>>, %arg2: memref<1x16x32xbf16, #tpu.memory_space<vmem>>, %arg3: memref<8x16xbf16, #tpu.memory_space<vmem>>, %arg4: memref<32x32xbf16, #tpu.memory_space<vmem>>, %arg5: memref<32x64xbf16, #tpu.memory_space<vmem>>, %arg6: memref<1x32xf32, #tpu.memory_space<vmem>>, %arg7: memref<1x64xf32, #tpu.memory_space<vmem>>, %arg8: memref<32x32xbf16, #tpu.memory_space<vmem>>, %arg9: memref<1x32xf32, #tpu.memory_space<vmem>>, %arg10: memref<1x32xf32, #tpu.memory_space<vmem>>, %arg11: memref<1x32xf32, #tpu.memory_space<vmem>>, %arg12: memref<1x8x32xf32, #tpu.memory_space<vmem>>, %arg13: memref<8x32xf32, #tpu.memory_space<vmem>>) attributes {dimension_semantics = [#tpu.dimension_semantics<parallel>], iteration_bounds = array<i64: 2>, scalar_prefetch = 0 : i64, scratch_operands = 1 : i64, tpu.core_type = #tpu.core_type<tc>, window_params = [{transform_indices = @transform_0, window_bounds = array<i64: 1, 8, 32>}, {transform_indices = @transform_1, window_bounds = array<i64: 1, 16, 32>}, {pipeline_mode = #tpu.pipeline_mode<synchronous>, transform_indices = @transform_2, window_bounds = array<i64: 8, 16>}, {pipeline_mode = #tpu.pipeline_mode<synchronous>, transform_indices = @transform_3, window_bounds = array<i64: 32, 32>}, {pipeline_mode = #tpu.pipeline_mode<synchronous>, transform_indices = @transform_4, window_bounds = array<i64: 32, 64>}, {pipeline_mode = #tpu.pipeline_mode<synchronous>, transform_indices = @transform_5, window_bounds = array<i64: 1, 32>}, {pipeline_mode = #tpu.pipeline_mode<synchronous>, transform_indices = @transform_6, window_bounds = array<i64: 1, 64>}, {pipeline_mode = #tpu.pipeline_mode<synchronous>, transform_indices = @transform_7, window_bounds = array<i64: 32, 32>}, {pipeline_mode = #tpu.pipeline_mode<synchronous>, transform_indices = @transform_8, window_bounds = array<i64: 1, 32>}, {pipeline_mode = #tpu.pipeline_mode<synchronous>, transform_indices = @transform_9, window_bounds = array<i64: 1, 32>}, {pipeline_mode = #tpu.pipeline_mode<synchronous>, transform_indices = @transform_10, window_bounds = array<i64: 1, 32>}, {transform_indices = @transform_11, window_bounds = array<i64: 1, 8, 32>}]} {
    %c0 = arith.constant 0 : index
    %c0_0 = arith.constant 0 : index
    %c0_1 = arith.constant 0 : index
    %0 = vector.load %arg1[%c0, %c0_0, %c0_1] : memref<1x8x32xf32, #tpu.memory_space<vmem>>, vector<1x8x32xf32>
    %1 = vector.shape_cast %0 : vector<1x8x32xf32> to vector<8x32xf32>
    %2 = arith.truncf %1 : vector<8x32xf32> to vector<8x32xbf16>
    %c0_2 = arith.constant 0 : index
    %c0_3 = arith.constant 0 : index
    %c0_4 = arith.constant 0 : index
    %3 = vector.load %arg2[%c0_2, %c0_3, %c0_4] : memref<1x16x32xbf16, #tpu.memory_space<vmem>>, vector<1x16x32xbf16>
    %4 = vector.shape_cast %3 : vector<1x16x32xbf16> to vector<16x32xbf16>
    %c0_5 = arith.constant 0 : index
    %c0_6 = arith.constant 0 : index
    %5 = vector.load %arg3[%c0_5, %c0_6] : memref<8x16xbf16, #tpu.memory_space<vmem>>, vector<8x16xbf16>
    %6 = arith.extf %5 : vector<8x16xbf16> to vector<8x16xf32>
    %c0_7 = arith.constant 0 : index
    %c0_8 = arith.constant 0 : index
    %7 = vector.load %arg4[%c0_7, %c0_8] : memref<32x32xbf16, #tpu.memory_space<vmem>>, vector<32x32xbf16>
    %cst = arith.constant dense<0.000000e+00> : vector<8x32xf32>
    %8 = tpu.matmul %2, %7, %cst {dimension_numbers = #tpu.dot_dimension_numbers<[1], [0], [0], [1], [0, 0, 1, 1], [], []>} : vector<8x32xbf16>, vector<32x32xbf16>, vector<8x32xf32> -> vector<8x32xf32>
    %c0_9 = arith.constant 0 : index
    %c0_10 = arith.constant 0 : index
    %9 = vector.load %arg6[%c0_9, %c0_10] : memref<1x32xf32, #tpu.memory_space<vmem>>, vector<1x32xf32>
    %10 = vector.broadcast %9 : vector<1x32xf32> to vector<8x32xf32>
    %11 = arith.addf %8, %10 : vector<8x32xf32>
    %c0_11 = arith.constant 0 : index
    %c0_12 = arith.constant 0 : index
    %12 = vector.load %arg5[%c0_11, %c0_12] : memref<32x64xbf16, #tpu.memory_space<vmem>>, vector<32x64xbf16>
    %cst_13 = arith.constant dense<0.000000e+00> : vector<16x64xf32>
    %13 = tpu.matmul %4, %12, %cst_13 {dimension_numbers = #tpu.dot_dimension_numbers<[1], [0], [0], [1], [0, 0, 1, 1], [], []>} : vector<16x32xbf16>, vector<32x64xbf16>, vector<16x64xf32> -> vector<16x64xf32>
    %c0_14 = arith.constant 0 : index
    %c0_15 = arith.constant 0 : index
    %14 = vector.load %arg7[%c0_14, %c0_15] : memref<1x64xf32, #tpu.memory_space<vmem>>, vector<1x64xf32>
    %15 = vector.broadcast %14 : vector<1x64xf32> to vector<16x64xf32>
    %16 = arith.addf %13, %15 : vector<16x64xf32>
    %17 = vector.extract_strided_slice %11 {offsets = [0, 0], sizes = [8, 8], strides = [1, 1]} : vector<8x32xf32> to vector<8x8xf32>
    %18 = arith.truncf %17 : vector<8x8xf32> to vector<8x8xbf16>
    %19 = vector.extract_strided_slice %16 {offsets = [0, 0], sizes = [16, 8], strides = [1, 1]} : vector<16x64xf32> to vector<16x8xf32>
    %20 = arith.truncf %19 : vector<16x8xf32> to vector<16x8xbf16>
    %21 = vector.extract_strided_slice %16 {offsets = [0, 32], sizes = [16, 8], strides = [1, 1]} : vector<16x64xf32> to vector<16x8xf32>
    %22 = arith.truncf %21 : vector<16x8xf32> to vector<16x8xbf16>
    "tpu.trace_start"() <{level = 10 : i32, message = "ld,sd->ls"}> : () -> ()
    %cst_16 = arith.constant dense<0.000000e+00> : vector<8x16xf32>
    %23 = tpu.matmul %18, %20, %cst_16 {dimension_numbers = #tpu.dot_dimension_numbers<[1], [1], [0], [0], [0, 0, 1, 0], [], []>} : vector<8x8xbf16>, vector<16x8xbf16>, vector<8x16xf32> -> vector<8x16xf32>
    "tpu.trace_stop"() : () -> ()
    %24 = arith.addf %23, %6 : vector<8x16xf32>
    %cst_17 = arith.constant dense<0xFF800000> : vector<8xf32>
    %25 = vector.multi_reduction <maximumf>, %24, %cst_17 [1] : vector<8x16xf32> to vector<8xf32>
    %26 = vector.shape_cast %25 : vector<8xf32> to vector<8x1xf32>
    %27 = vector.broadcast %26 : vector<8x1xf32> to vector<8x16xf32>
    %28 = arith.subf %24, %27 : vector<8x16xf32>
    %29 = math.exp %28 : vector<8x16xf32>
    %cst_18 = arith.constant dense<0.000000e+00> : vector<8xf32>
    %30 = vector.multi_reduction <add>, %29, %cst_18 [1] : vector<8x16xf32> to vector<8xf32>
    %31 = vector.shape_cast %30 : vector<8xf32> to vector<8x1xf32>
    %32 = tpu.reciprocal %31 {approx = true} : vector<8x1xf32> -> vector<8x1xf32>
    %33 = vector.broadcast %32 : vector<8x1xf32> to vector<8x16xf32>
    %34 = arith.mulf %29, %33 : vector<8x16xf32>
    %35 = arith.truncf %34 : vector<8x16xf32> to vector<8x16xbf16>
    %cst_19 = arith.constant dense<0.000000e+00> : vector<8x8xf32>
    %36 = tpu.matmul %35, %22, %cst_19 {dimension_numbers = #tpu.dot_dimension_numbers<[1], [0], [0], [1], [0, 0, 1, 1], [], []>} : vector<8x16xbf16>, vector<16x8xbf16>, vector<8x8xf32> -> vector<8x8xf32>
    %c0_20 = arith.constant 0 : index
    %c0_21 = arith.constant 0 : index
    %37 = vector.load %arg13[%c0_20, %c0_21] : memref<8x32xf32, #tpu.memory_space<vmem>>, vector<8x8xf32>
    tpu.vector_store %arg13[%c0_20, %c0_21], %36 {strides = array<i32>} : memref<8x32xf32, #tpu.memory_space<vmem>>, vector<8x8xf32>,
    %38 = vector.extract_strided_slice %11 {offsets = [0, 8], sizes = [8, 8], strides = [1, 1]} : vector<8x32xf32> to vector<8x8xf32>
    %39 = arith.truncf %38 : vector<8x8xf32> to vector<8x8xbf16>
    %40 = vector.extract_strided_slice %16 {offsets = [0, 8], sizes = [16, 8], strides = [1, 1]} : vector<16x64xf32> to vector<16x8xf32>
    %41 = arith.truncf %40 : vector<16x8xf32> to vector<16x8xbf16>
    %42 = vector.extract_strided_slice %16 {offsets = [0, 40], sizes = [16, 8], strides = [1, 1]} : vector<16x64xf32> to vector<16x8xf32>
    %43 = arith.truncf %42 : vector<16x8xf32> to vector<16x8xbf16>
    "tpu.trace_start"() <{level = 10 : i32, message = "ld,sd->ls"}> : () -> ()
    %cst_22 = arith.constant dense<0.000000e+00> : vector<8x16xf32>
    %44 = tpu.matmul %39, %41, %cst_22 {dimension_numbers = #tpu.dot_dimension_numbers<[1], [1], [0], [0], [0, 0, 1, 0], [], []>} : vector<8x8xbf16>, vector<16x8xbf16>, vector<8x16xf32> -> vector<8x16xf32>
    "tpu.trace_stop"() : () -> ()
    %45 = arith.addf %44, %6 : vector<8x16xf32>
    %cst_23 = arith.constant dense<0xFF800000> : vector<8xf32>
    %46 = vector.multi_reduction <maximumf>, %45, %cst_23 [1] : vector<8x16xf32> to vector<8xf32>
    %47 = vector.shape_cast %46 : vector<8xf32> to vector<8x1xf32>
    %48 = vector.broadcast %47 : vector<8x1xf32> to vector<8x16xf32>
    %49 = arith.subf %45, %48 : vector<8x16xf32>
    %50 = math.exp %49 : vector<8x16xf32>
    %cst_24 = arith.constant dense<0.000000e+00> : vector<8xf32>
    %51 = vector.multi_reduction <add>, %50, %cst_24 [1] : vector<8x16xf32> to vector<8xf32>
    %52 = vector.shape_cast %51 : vector<8xf32> to vector<8x1xf32>
    %53 = tpu.reciprocal %52 {approx = true} : vector<8x1xf32> -> vector<8x1xf32>
    %54 = vector.broadcast %53 : vector<8x1xf32> to vector<8x16xf32>
    %55 = arith.mulf %50, %54 : vector<8x16xf32>
    %56 = arith.truncf %55 : vector<8x16xf32> to vector<8x16xbf16>
    %cst_25 = arith.constant dense<0.000000e+00> : vector<8x8xf32>
    %57 = tpu.matmul %56, %43, %cst_25 {dimension_numbers = #tpu.dot_dimension_numbers<[1], [0], [0], [1], [0, 0, 1, 1], [], []>} : vector<8x16xbf16>, vector<16x8xbf16>, vector<8x8xf32> -> vector<8x8xf32>
    %c0_26 = arith.constant 0 : index
    %c8 = arith.constant 8 : index
    %58 = vector.load %arg13[%c0_26, %c8] : memref<8x32xf32, #tpu.memory_space<vmem>>, vector<8x8xf32>
    tpu.vector_store %arg13[%c0_26, %c8], %57 {strides = array<i32>} : memref<8x32xf32, #tpu.memory_space<vmem>>, vector<8x8xf32>,
    %59 = vector.extract_strided_slice %11 {offsets = [0, 16], sizes = [8, 8], strides = [1, 1]} : vector<8x32xf32> to vector<8x8xf32>
    %60 = arith.truncf %59 : vector<8x8xf32> to vector<8x8xbf16>
    %61 = vector.extract_strided_slice %16 {offsets = [0, 16], sizes = [16, 8], strides = [1, 1]} : vector<16x64xf32> to vector<16x8xf32>
    %62 = arith.truncf %61 : vector<16x8xf32> to vector<16x8xbf16>
    %63 = vector.extract_strided_slice %16 {offsets = [0, 48], sizes = [16, 8], strides = [1, 1]} : vector<16x64xf32> to vector<16x8xf32>
    %64 = arith.truncf %63 : vector<16x8xf32> to vector<16x8xbf16>
    "tpu.trace_start"() <{level = 10 : i32, message = "ld,sd->ls"}> : () -> ()
    %cst_27 = arith.constant dense<0.000000e+00> : vector<8x16xf32>
    %65 = tpu.matmul %60, %62, %cst_27 {dimension_numbers = #tpu.dot_dimension_numbers<[1], [1], [0], [0], [0, 0, 1, 0], [], []>} : vector<8x8xbf16>, vector<16x8xbf16>, vector<8x16xf32> -> vector<8x16xf32>
    "tpu.trace_stop"() : () -> ()
    %66 = arith.addf %65, %6 : vector<8x16xf32>
    %cst_28 = arith.constant dense<0xFF800000> : vector<8xf32>
    %67 = vector.multi_reduction <maximumf>, %66, %cst_28 [1] : vector<8x16xf32> to vector<8xf32>
    %68 = vector.shape_cast %67 : vector<8xf32> to vector<8x1xf32>
    %69 = vector.broadcast %68 : vector<8x1xf32> to vector<8x16xf32>
    %70 = arith.subf %66, %69 : vector<8x16xf32>
    %71 = math.exp %70 : vector<8x16xf32>
    %cst_29 = arith.constant dense<0.000000e+00> : vector<8xf32>
    %72 = vector.multi_reduction <add>, %71, %cst_29 [1] : vector<8x16xf32> to vector<8xf32>
    %73 = vector.shape_cast %72 : vector<8xf32> to vector<8x1xf32>
    %74 = tpu.reciprocal %73 {approx = true} : vector<8x1xf32> -> vector<8x1xf32>
    %75 = vector.broadcast %74 : vector<8x1xf32> to vector<8x16xf32>
    %76 = arith.mulf %71, %75 : vector<8x16xf32>
    %77 = arith.truncf %76 : vector<8x16xf32> to vector<8x16xbf16>
    %cst_30 = arith.constant dense<0.000000e+00> : vector<8x8xf32>
    %78 = tpu.matmul %77, %64, %cst_30 {dimension_numbers = #tpu.dot_dimension_numbers<[1], [0], [0], [1], [0, 0, 1, 1], [], []>} : vector<8x16xbf16>, vector<16x8xbf16>, vector<8x8xf32> -> vector<8x8xf32>
    %c0_31 = arith.constant 0 : index
    %c16 = arith.constant 16 : index
    %79 = vector.load %arg13[%c0_31, %c16] : memref<8x32xf32, #tpu.memory_space<vmem>>, vector<8x8xf32>
    tpu.vector_store %arg13[%c0_31, %c16], %78 {strides = array<i32>} : memref<8x32xf32, #tpu.memory_space<vmem>>, vector<8x8xf32>,
    %80 = vector.extract_strided_slice %11 {offsets = [0, 24], sizes = [8, 8], strides = [1, 1]} : vector<8x32xf32> to vector<8x8xf32>
    %81 = arith.truncf %80 : vector<8x8xf32> to vector<8x8xbf16>
    %82 = vector.extract_strided_slice %16 {offsets = [0, 24], sizes = [16, 8], strides = [1, 1]} : vector<16x64xf32> to vector<16x8xf32>
    %83 = arith.truncf %82 : vector<16x8xf32> to vector<16x8xbf16>
    %84 = vector.extract_strided_slice %16 {offsets = [0, 56], sizes = [16, 8], strides = [1, 1]} : vector<16x64xf32> to vector<16x8xf32>
    %85 = arith.truncf %84 : vector<16x8xf32> to vector<16x8xbf16>
    "tpu.trace_start"() <{level = 10 : i32, message = "ld,sd->ls"}> : () -> ()
    %cst_32 = arith.constant dense<0.000000e+00> : vector<8x16xf32>
    %86 = tpu.matmul %81, %83, %cst_32 {dimension_numbers = #tpu.dot_dimension_numbers<[1], [1], [0], [0], [0, 0, 1, 0], [], []>} : vector<8x8xbf16>, vector<16x8xbf16>, vector<8x16xf32> -> vector<8x16xf32>
    "tpu.trace_stop"() : () -> ()
    %87 = arith.addf %86, %6 : vector<8x16xf32>
    %cst_33 = arith.constant dense<0xFF800000> : vector<8xf32>
    %88 = vector.multi_reduction <maximumf>, %87, %cst_33 [1] : vector<8x16xf32> to vector<8xf32>
    %89 = vector.shape_cast %88 : vector<8xf32> to vector<8x1xf32>
    %90 = vector.broadcast %89 : vector<8x1xf32> to vector<8x16xf32>
    %91 = arith.subf %87, %90 : vector<8x16xf32>
    %92 = math.exp %91 : vector<8x16xf32>
    %cst_34 = arith.constant dense<0.000000e+00> : vector<8xf32>
    %93 = vector.multi_reduction <add>, %92, %cst_34 [1] : vector<8x16xf32> to vector<8xf32>
    %94 = vector.shape_cast %93 : vector<8xf32> to vector<8x1xf32>
    %95 = tpu.reciprocal %94 {approx = true} : vector<8x1xf32> -> vector<8x1xf32>
    %96 = vector.broadcast %95 : vector<8x1xf32> to vector<8x16xf32>
    %97 = arith.mulf %92, %96 : vector<8x16xf32>
    %98 = arith.truncf %97 : vector<8x16xf32> to vector<8x16xbf16>
    %cst_35 = arith.constant dense<0.000000e+00> : vector<8x8xf32>
    %99 = tpu.matmul %98, %85, %cst_35 {dimension_numbers = #tpu.dot_dimension_numbers<[1], [0], [0], [1], [0, 0, 1, 1], [], []>} : vector<8x16xbf16>, vector<16x8xbf16>, vector<8x8xf32> -> vector<8x8xf32>
    %c0_36 = arith.constant 0 : index
    %c24 = arith.constant 24 : index
    %100 = vector.load %arg13[%c0_36, %c24] : memref<8x32xf32, #tpu.memory_space<vmem>>, vector<8x8xf32>
    tpu.vector_store %arg13[%c0_36, %c24], %99 {strides = array<i32>} : memref<8x32xf32, #tpu.memory_space<vmem>>, vector<8x8xf32>,
    %c0_37 = arith.constant 0 : index
    %c0_38 = arith.constant 0 : index
    %101 = vector.load %arg13[%c0_37, %c0_38] : memref<8x32xf32, #tpu.memory_space<vmem>>, vector<8x32xf32>
    %102 = arith.truncf %101 : vector<8x32xf32> to vector<8x32xbf16>
    %c0_39 = arith.constant 0 : index
    %c0_40 = arith.constant 0 : index
    %103 = vector.load %arg8[%c0_39, %c0_40] : memref<32x32xbf16, #tpu.memory_space<vmem>>, vector<32x32xbf16>
    %cst_41 = arith.constant dense<0.000000e+00> : vector<8x32xf32>
    %104 = tpu.matmul %102, %103, %cst_41 {dimension_numbers = #tpu.dot_dimension_numbers<[1], [0], [0], [1], [0, 0, 1, 1], [], []>} : vector<8x32xbf16>, vector<32x32xbf16>, vector<8x32xf32> -> vector<8x32xf32>
    %c0_42 = arith.constant 0 : index
    %c0_43 = arith.constant 0 : index
    %105 = vector.load %arg9[%c0_42, %c0_43] : memref<1x32xf32, #tpu.memory_space<vmem>>, vector<1x32xf32>
    %106 = vector.broadcast %105 : vector<1x32xf32> to vector<8x32xf32>
    %107 = arith.addf %104, %106 : vector<8x32xf32>
    %108 = arith.addf %107, %1 : vector<8x32xf32>
    %cst_44 = arith.constant dense<0.000000e+00> : vector<8xf32>
    %109 = vector.multi_reduction <add>, %108, %cst_44 [1] : vector<8x32xf32> to vector<8xf32>
    %110 = vector.shape_cast %109 : vector<8xf32> to vector<8x1xf32>
    %cst_45 = arith.constant 3.200000e+01 : f32
    %111 = vector.broadcast %cst_45 : f32 to vector<8x1xf32>
    %112 = arith.divf %110, %111 : vector<8x1xf32>
    %113 = vector.broadcast %112 : vector<8x1xf32> to vector<8x32xf32>
    %114 = arith.subf %108, %113 : vector<8x32xf32>
    %115 = arith.mulf %114, %114 : vector<8x32xf32>
    %cst_46 = arith.constant dense<0.000000e+00> : vector<8xf32>
    %116 = vector.multi_reduction <add>, %115, %cst_46 [1] : vector<8x32xf32> to vector<8xf32>
    %117 = vector.shape_cast %116 : vector<8xf32> to vector<8x1xf32>
    %cst_47 = arith.constant 3.200000e+01 : f32
    %118 = vector.broadcast %cst_47 : f32 to vector<8x1xf32>
    %119 = arith.divf %117, %118 : vector<8x1xf32>
    %120 = vector.broadcast %112 : vector<8x1xf32> to vector<8x32xf32>
    %121 = arith.subf %108, %120 : vector<8x32xf32>
    %cst_48 = arith.constant 9.99999974E-6 : f32
    %122 = vector.broadcast %cst_48 : f32 to vector<8x1xf32>
    %123 = arith.addf %119, %122 : vector<8x1xf32>
    %124 = math.rsqrt %123 : vector<8x1xf32>
    %125 = vector.broadcast %124 : vector<8x1xf32> to vector<8x32xf32>
    %126 = arith.mulf %121, %125 : vector<8x32xf32>
    %c0_49 = arith.constant 0 : index
    %c0_50 = arith.constant 0 : index
    %127 = vector.load %arg10[%c0_49, %c0_50] : memref<1x32xf32, #tpu.memory_space<vmem>>, vector<1x32xf32>
    %128 = vector.broadcast %127 : vector<1x32xf32> to vector<8x32xf32>
    %129 = arith.mulf %126, %128 : vector<8x32xf32>
    %c0_51 = arith.constant 0 : index
    %c0_52 = arith.constant 0 : index
    %130 = vector.load %arg11[%c0_51, %c0_52] : memref<1x32xf32, #tpu.memory_space<vmem>>, vector<1x32xf32>
    %131 = vector.broadcast %130 : vector<1x32xf32> to vector<8x32xf32>
    %132 = arith.addf %129, %131 : vector<8x32xf32>
    %c0_53 = arith.constant 0 : index
    %c0_54 = arith.constant 0 : index
    %c0_55 = arith.constant 0 : index
    %133 = vector.load %arg12[%c0_53, %c0_54, %c0_55] : memref<1x8x32xf32, #tpu.memory_space<vmem>>, vector<1x8x32xf32>
    %134 = vector.shape_cast %133 : vector<1x8x32xf32> to vector<8x32xf32>
    %135 = vector.shape_cast %132 : vector<8x32xf32> to vector<1x8x32xf32>
    tpu.vector_store %arg12[%c0_53, %c0_54, %c0_55], %135 {strides = array<i32>} : memref<1x8x32xf32, #tpu.memory_space<vmem>>, vector<1x8x32xf32>,
    return
  }
  func.func @transform_0(%arg0: i32) -> (i32, i32, i32) {
    %c0_i32 = arith.constant 0 : i32
    %c0_i32_0 = arith.constant 0 : i32
    %c0_i32_1 = arith.constant 0 : i32
    return %arg0, %c0_i32, %c0_i32_0 : i32, i32, i32
  }
  func.func @transform_1(%arg0: i32) -> (i32, i32, i32) {
    %c0_i32 = arith.constant 0 : i32
    %c0_i32_0 = arith.constant 0 : i32
    %c0_i32_1 = arith.constant 0 : i32
    return %arg0, %c0_i32, %c0_i32_0 : i32, i32, i32
  }
  func.func @transform_2(%arg0: i32) -> (i32, i32) {
    %c0_i32 = arith.constant 0 : i32
    %c0_i32_0 = arith.constant 0 : i32
    %c0_i32_1 = arith.constant 0 : i32
    return %c0_i32, %c0_i32_0 : i32, i32
  }
  func.func @transform_3(%arg0: i32) -> (i32, i32) {
    %c0_i32 = arith.constant 0 : i32
    %c0_i32_0 = arith.constant 0 : i32
    %c0_i32_1 = arith.constant 0 : i32
    return %c0_i32, %c0_i32_0 : i32, i32
  }
  func.func @transform_4(%arg0: i32) -> (i32, i32) {
    %c0_i32 = arith.constant 0 : i32
    %c0_i32_0 = arith.constant 0 : i32
    %c0_i32_1 = arith.constant 0 : i32
    return %c0_i32, %c0_i32_0 : i32, i32
  }
  func.func @transform_5(%arg0: i32) -> (i32, i32) {
    %c0_i32 = arith.constant 0 : i32
    %c0_i32_0 = arith.constant 0 : i32
    %c0_i32_1 = arith.constant 0 : i32
    return %c0_i32, %c0_i32_0 : i32, i32
  }
  func.func @transform_6(%arg0: i32) -> (i32, i32) {
    %c0_i32 = arith.constant 0 : i32
    %c0_i32_0 = arith.constant 0 : i32
    %c0_i32_1 = arith.constant 0 : i32
    return %c0_i32, %c0_i32_0 : i32, i32
  }
  func.func @transform_7(%arg0: i32) -> (i32, i32) {
    %c0_i32 = arith.constant 0 : i32
    %c0_i32_0 = arith.constant 0 : i32
    %c0_i32_1 = arith.constant 0 : i32
    return %c0_i32, %c0_i32_0 : i32, i32
  }
  func.func @transform_8(%arg0: i32) -> (i32, i32) {
    %c0_i32 = arith.constant 0 : i32
    %c0_i32_0 = arith.constant 0 : i32
    %c0_i32_1 = arith.constant 0 : i32
    return %c0_i32, %c0_i32_0 : i32, i32
  }
  func.func @transform_9(%arg0: i32) -> (i32, i32) {
    %c0_i32 = arith.constant 0 : i32
    %c0_i32_0 = arith.constant 0 : i32
    %c0_i32_1 = arith.constant 0 : i32
    return %c0_i32, %c0_i32_0 : i32, i32
  }
  func.func @transform_10(%arg0: i32) -> (i32, i32) {
    %c0_i32 = arith.constant 0 : i32
    %c0_i32_0 = arith.constant 0 : i32
    %c0_i32_1 = arith.constant 0 : i32
    return %c0_i32, %c0_i32_0 : i32, i32
  }
  func.func @transform_11(%arg0: i32) -> (i32, i32, i32) {
    %c0_i32 = arith.constant 0 : i32
    %c0_i32_0 = arith.constant 0 : i32
    %c0_i32_1 = arith.constant 0 : i32
    return %arg0, %c0_i32, %c0_i32_0 : i32, i32, i32
  }
}

module attributes {stable_mosaic.version = 11 : i64} {
  func.func @_cross_attention_kernel(%arg0: i32, %arg1: memref<1x8x32xf32, #tpu.memory_space<vmem>>, %arg2: memref<1x16x32xbf16, #tpu.memory_space<vmem>>, %arg3: memref<8x16xbf16, #tpu.memory_space<vmem>>, %arg4: memref<32x32xbf16, #tpu.memory_space<vmem>>, %arg5: memref<32x64xbf16, #tpu.memory_space<vmem>>, %arg6: memref<1x32xf32, #tpu.memory_space<vmem>>, %arg7: memref<1x64xf32, #tpu.memory_space<vmem>>, %arg8: memref<32x32xbf16, #tpu.memory_space<vmem>>, %arg9: memref<1x32xf32, #tpu.memory_space<vmem>>, %arg10: memref<1x32xf32, #tpu.memory_space<vmem>>, %arg11: memref<1x32xf32, #tpu.memory_space<vmem>>, %arg12: memref<1x8x32xf32, #tpu.memory_space<vmem>>, %arg13: memref<8x32xf32, #tpu.memory_space<vmem>>) attributes {dimension_semantics = [#tpu.dimension_semantics<parallel>], iteration_bounds = array<i64: 2>, scalar_prefetch = 0 : i64, scratch_operands = 1 : i64, tpu.core_type = #tpu.core_type<tc>, window_params = [{transform_indices = @transform_0, window_bounds = array<i64: 1, 8, 32>}, {transform_indices = @transform_1, window_bounds = array<i64: 1, 16, 32>}, {pipeline_mode = #tpu.pipeline_mode<synchronous>, transform_indices = @transform_2, window_bounds = array<i64: 8, 16>}, {pipeline_mode = #tpu.pipeline_mode<synchronous>, transform_indices = @transform_3, window_bounds = array<i64: 32, 32>}, {pipeline_mode = #tpu.pipeline_mode<synchronous>, transform_indices = @transform_4, window_bounds = array<i64: 32, 64>}, {pipeline_mode = #tpu.pipeline_mode<synchronous>, transform_indices = @transform_5, window_bounds = array<i64: 1, 32>}, {pipeline_mode = #tpu.pipeline_mode<synchronous>, transform_indices = @transform_6, window_bounds = array<i64: 1, 64>}, {pipeline_mode = #tpu.pipeline_mode<synchronous>, transform_indices = @transform_7, window_bounds = array<i64: 32, 32>}, {pipeline_mode = #tpu.pipeline_mode<synchronous>, transform_indices = @transform_8, window_bounds = array<i64: 1, 32>}, {pipeline_mode = #tpu.pipeline_mode<synchronous>, transform_indices = @transform_9, window_bounds = array<i64: 1, 32>}, {pipeline_mode = #tpu.pipeline_mode<synchronous>, transform_indices = @transform_10, window_bounds = array<i64: 1, 32>}, {transform_indices = @transform_11, window_bounds = array<i64: 1, 8, 32>}]} {
    %c0 = arith.constant 0 : index
    %c0_0 = arith.constant 0 : index
    %c0_1 = arith.constant 0 : index
    %0 = vector.load %arg1[%c0, %c0_0, %c0_1] : memref<1x8x32xf32, #tpu.memory_space<vmem>>, vector<1x8x32xf32>
    %1 = vector.shape_cast %0 : vector<1x8x32xf32> to vector<8x32xf32>
    %2 = arith.truncf %1 : vector<8x32xf32> to vector<8x32xbf16>
    %c0_2 = arith.constant 0 : index
    %c0_3 = arith.constant 0 : index
    %c0_4 = arith.constant 0 : index
    %3 = vector.load %arg2[%c0_2, %c0_3, %c0_4] : memref<1x16x32xbf16, #tpu.memory_space<vmem>>, vector<1x16x32xbf16>
    %4 = vector.shape_cast %3 : vector<1x16x32xbf16> to vector<16x32xbf16>
    %c0_5 = arith.constant 0 : index
    %c0_6 = arith.constant 0 : index
    %5 = vector.load %arg3[%c0_5, %c0_6] : memref<8x16xbf16, #tpu.memory_space<vmem>>, vector<8x16xbf16>
    %6 = arith.extf %5 : vector<8x16xbf16> to vector<8x16xf32>
    %c0_7 = arith.constant 0 : index
    %c0_8 = arith.constant 0 : index
    %7 = vector.load %arg4[%c0_7, %c0_8] : memref<32x32xbf16, #tpu.memory_space<vmem>>, vector<32x32xbf16>
    %cst = arith.constant dense<0.000000e+00> : vector<8x32xf32>
    %8 = tpu.matmul %2, %7, %cst {dimension_numbers = #tpu.dot_dimension_numbers<[1], [0], [0], [1], [0, 0, 1, 1], [], []>} : vector<8x32xbf16>, vector<32x32xbf16>, vector<8x32xf32> -> vector<8x32xf32>
    %c0_9 = arith.constant 0 : index
    %c0_10 = arith.constant 0 : index
    %9 = vector.load %arg6[%c0_9, %c0_10] : memref<1x32xf32, #tpu.memory_space<vmem>>, vector<1x32xf32>
    %10 = vector.broadcast %9 : vector<1x32xf32> to vector<8x32xf32>
    %11 = arith.addf %8, %10 : vector<8x32xf32>
    %c0_11 = arith.constant 0 : index
    %c0_12 = arith.constant 0 : index
    %12 = vector.load %arg5[%c0_11, %c0_12] : memref<32x64xbf16, #tpu.memory_space<vmem>>, vector<32x64xbf16>
    %cst_13 = arith.constant dense<0.000000e+00> : vector<16x64xf32>
    %13 = tpu.matmul %4, %12, %cst_13 {dimension_numbers = #tpu.dot_dimension_numbers<[1], [0], [0], [1], [0, 0, 1, 1], [], []>} : vector<16x32xbf16>, vector<32x64xbf16>, vector<16x64xf32> -> vector<16x64xf32>
    %c0_14 = arith.constant 0 : index
    %c0_15 = arith.constant 0 : index
    %14 = vector.load %arg7[%c0_14, %c0_15] : memref<1x64xf32, #tpu.memory_space<vmem>>, vector<1x64xf32>
    %15 = vector.broadcast %14 : vector<1x64xf32> to vector<16x64xf32>
    %16 = arith.addf %13, %15 : vector<16x64xf32>
    %17 = vector.extract_strided_slice %11 {offsets = [0, 0], sizes = [8, 8], strides = [1, 1]} : vector<8x32xf32> to vector<8x8xf32>
    %18 = arith.truncf %17 : vector<8x8xf32> to vector<8x8xbf16>
    %19 = vector.extract_strided_slice %16 {offsets = [0, 0], sizes = [16, 8], strides = [1, 1]} : vector<16x64xf32> to vector<16x8xf32>
    %20 = arith.truncf %19 : vector<16x8xf32> to vector<16x8xbf16>
    %21 = vector.extract_strided_slice %16 {offsets = [0, 32], sizes = [16, 8], strides = [1, 1]} : vector<16x64xf32> to vector<16x8xf32>
    %22 = arith.truncf %21 : vector<16x8xf32> to vector<16x8xbf16>
    "tpu.trace_start"() <{level = 10 : i32, message = "ld,sd->ls"}> : () -> ()
    %cst_16 = arith.constant dense<0.000000e+00> : vector<8x16xf32>
    %23 = tpu.matmul %18, %20, %cst_16 {dimension_numbers = #tpu.dot_dimension_numbers<[1], [1], [0], [0], [0, 0, 1, 0], [], []>} : vector<8x8xbf16>, vector<16x8xbf16>, vector<8x16xf32> -> vector<8x16xf32>
    "tpu.trace_stop"() : () -> ()
    %24 = arith.addf %23, %6 : vector<8x16xf32>
    %cst_17 = arith.constant dense<0xFF800000> : vector<8xf32>
    %25 = vector.multi_reduction <maximumf>, %24, %cst_17 [1] : vector<8x16xf32> to vector<8xf32>
    %26 = vector.shape_cast %25 : vector<8xf32> to vector<8x1xf32>
    %27 = vector.broadcast %26 : vector<8x1xf32> to vector<8x16xf32>
    %28 = arith.subf %24, %27 : vector<8x16xf32>
    %29 = math.exp %28 : vector<8x16xf32>
    %cst_18 = arith.constant dense<0.000000e+00> : vector<8xf32>
    %30 = vector.multi_reduction <add>, %29, %cst_18 [1] : vector<8x16xf32> to vector<8xf32>
    %31 = vector.shape_cast %30 : vector<8xf32> to vector<8x1xf32>
    %32 = tpu.reciprocal %31 {approx = true} : vector<8x1xf32> -> vector<8x1xf32>
    %33 = vector.broadcast %32 : vector<8x1xf32> to vector<8x16xf32>
    %34 = arith.mulf %29, %33 : vector<8x16xf32>
    %35 = arith.truncf %34 : vector<8x16xf32> to vector<8x16xbf16>
    %cst_19 = arith.constant dense<0.000000e+00> : vector<8x8xf32>
    %36 = tpu.matmul %35, %22, %cst_19 {dimension_numbers = #tpu.dot_dimension_numbers<[1], [0], [0], [1], [0, 0, 1, 1], [], []>} : vector<8x16xbf16>, vector<16x8xbf16>, vector<8x8xf32> -> vector<8x8xf32>
    %c0_20 = arith.constant 0 : index
    %c0_21 = arith.constant 0 : index
    %37 = vector.load %arg13[%c0_20, %c0_21] : memref<8x32xf32, #tpu.memory_space<vmem>>, vector<8x8xf32>
    tpu.vector_store %arg13[%c0_20, %c0_21], %36 {strides = array<i32>} : memref<8x32xf32, #tpu.memory_space<vmem>>, vector<8x8xf32>,
    %38 = vector.extract_strided_slice %11 {offsets = [0, 8], sizes = [8, 8], strides = [1, 1]} : vector<8x32xf32> to vector<8x8xf32>
    %39 = arith.truncf %38 : vector<8x8xf32> to vector<8x8xbf16>
    %40 = vector.extract_strided_slice %16 {offsets = [0, 8], sizes = [16, 8], strides = [1, 1]} : vector<16x64xf32> to vector<16x8xf32>
    %41 = arith.truncf %40 : vector<16x8xf32> to vector<16x8xbf16>
    %42 = vector.extract_strided_slice %16 {offsets = [0, 40], sizes = [16, 8], strides = [1, 1]} : vector<16x64xf32> to vector<16x8xf32>
    %43 = arith.truncf %42 : vector<16x8xf32> to vector<16x8xbf16>
    "tpu.trace_start"() <{level = 10 : i32, message = "ld,sd->ls"}> : () -> ()
    %cst_22 = arith.constant dense<0.000000e+00> : vector<8x16xf32>
    %44 = tpu.matmul %39, %41, %cst_22 {dimension_numbers = #tpu.dot_dimension_numbers<[1], [1], [0], [0], [0, 0, 1, 0], [], []>} : vector<8x8xbf16>, vector<16x8xbf16>, vector<8x16xf32> -> vector<8x16xf32>
    "tpu.trace_stop"() : () -> ()
    %45 = arith.addf %44, %6 : vector<8x16xf32>
    %cst_23 = arith.constant dense<0xFF800000> : vector<8xf32>
    %46 = vector.multi_reduction <maximumf>, %45, %cst_23 [1] : vector<8x16xf32> to vector<8xf32>
    %47 = vector.shape_cast %46 : vector<8xf32> to vector<8x1xf32>
    %48 = vector.broadcast %47 : vector<8x1xf32> to vector<8x16xf32>
    %49 = arith.subf %45, %48 : vector<8x16xf32>
    %50 = math.exp %49 : vector<8x16xf32>
    %cst_24 = arith.constant dense<0.000000e+00> : vector<8xf32>
    %51 = vector.multi_reduction <add>, %50, %cst_24 [1] : vector<8x16xf32> to vector<8xf32>
    %52 = vector.shape_cast %51 : vector<8xf32> to vector<8x1xf32>
    %53 = tpu.reciprocal %52 {approx = true} : vector<8x1xf32> -> vector<8x1xf32>
    %54 = vector.broadcast %53 : vector<8x1xf32> to vector<8x16xf32>
    %55 = arith.mulf %50, %54 : vector<8x16xf32>
    %56 = arith.truncf %55 : vector<8x16xf32> to vector<8x16xbf16>
    %cst_25 = arith.constant dense<0.000000e+00> : vector<8x8xf32>
    %57 = tpu.matmul %56, %43, %cst_25 {dimension_numbers = #tpu.dot_dimension_numbers<[1], [0], [0], [1], [0, 0, 1, 1], [], []>} : vector<8x16xbf16>, vector<16x8xbf16>, vector<8x8xf32> -> vector<8x8xf32>
    %c0_26 = arith.constant 0 : index
    %c8 = arith.constant 8 : index
    %58 = vector.load %arg13[%c0_26, %c8] : memref<8x32xf32, #tpu.memory_space<vmem>>, vector<8x8xf32>
    tpu.vector_store %arg13[%c0_26, %c8], %57 {strides = array<i32>} : memref<8x32xf32, #tpu.memory_space<vmem>>, vector<8x8xf32>,
    %59 = vector.extract_strided_slice %11 {offsets = [0, 16], sizes = [8, 8], strides = [1, 1]} : vector<8x32xf32> to vector<8x8xf32>
    %60 = arith.truncf %59 : vector<8x8xf32> to vector<8x8xbf16>
    %61 = vector.extract_strided_slice %16 {offsets = [0, 16], sizes = [16, 8], strides = [1, 1]} : vector<16x64xf32> to vector<16x8xf32>
    %62 = arith.truncf %61 : vector<16x8xf32> to vector<16x8xbf16>
    %63 = vector.extract_strided_slice %16 {offsets = [0, 48], sizes = [16, 8], strides = [1, 1]} : vector<16x64xf32> to vector<16x8xf32>
    %64 = arith.truncf %63 : vector<16x8xf32> to vector<16x8xbf16>
    "tpu.trace_start"() <{level = 10 : i32, message = "ld,sd->ls"}> : () -> ()
    %cst_27 = arith.constant dense<0.000000e+00> : vector<8x16xf32>
    %65 = tpu.matmul %60, %62, %cst_27 {dimension_numbers = #tpu.dot_dimension_numbers<[1], [1], [0], [0], [0, 0, 1, 0], [], []>} : vector<8x8xbf16>, vector<16x8xbf16>, vector<8x16xf32> -> vector<8x16xf32>
    "tpu.trace_stop"() : () -> ()
    %66 = arith.addf %65, %6 : vector<8x16xf32>
    %cst_28 = arith.constant dense<0xFF800000> : vector<8xf32>
    %67 = vector.multi_reduction <maximumf>, %66, %cst_28 [1] : vector<8x16xf32> to vector<8xf32>
    %68 = vector.shape_cast %67 : vector<8xf32> to vector<8x1xf32>
    %69 = vector.broadcast %68 : vector<8x1xf32> to vector<8x16xf32>
    %70 = arith.subf %66, %69 : vector<8x16xf32>
    %71 = math.exp %70 : vector<8x16xf32>
    %cst_29 = arith.constant dense<0.000000e+00> : vector<8xf32>
    %72 = vector.multi_reduction <add>, %71, %cst_29 [1] : vector<8x16xf32> to vector<8xf32>
    %73 = vector.shape_cast %72 : vector<8xf32> to vector<8x1xf32>
    %74 = tpu.reciprocal %73 {approx = true} : vector<8x1xf32> -> vector<8x1xf32>
    %75 = vector.broadcast %74 : vector<8x1xf32> to vector<8x16xf32>
    %76 = arith.mulf %71, %75 : vector<8x16xf32>
    %77 = arith.truncf %76 : vector<8x16xf32> to vector<8x16xbf16>
    %cst_30 = arith.constant dense<0.000000e+00> : vector<8x8xf32>
    %78 = tpu.matmul %77, %64, %cst_30 {dimension_numbers = #tpu.dot_dimension_numbers<[1], [0], [0], [1], [0, 0, 1, 1], [], []>} : vector<8x16xbf16>, vector<16x8xbf16>, vector<8x8xf32> -> vector<8x8xf32>
    %c0_31 = arith.constant 0 : index
    %c16 = arith.constant 16 : index
    %79 = vector.load %arg13[%c0_31, %c16] : memref<8x32xf32, #tpu.memory_space<vmem>>, vector<8x8xf32>
    tpu.vector_store %arg13[%c0_31, %c16], %78 {strides = array<i32>} : memref<8x32xf32, #tpu.memory_space<vmem>>, vector<8x8xf32>,
    %80 = vector.extract_strided_slice %11 {offsets = [0, 24], sizes = [8, 8], strides = [1, 1]} : vector<8x32xf32> to vector<8x8xf32>
    %81 = arith.truncf %80 : vector<8x8xf32> to vector<8x8xbf16>
    %82 = vector.extract_strided_slice %16 {offsets = [0, 24], sizes = [16, 8], strides = [1, 1]} : vector<16x64xf32> to vector<16x8xf32>
    %83 = arith.truncf %82 : vector<16x8xf32> to vector<16x8xbf16>
    %84 = vector.extract_strided_slice %16 {offsets = [0, 56], sizes = [16, 8], strides = [1, 1]} : vector<16x64xf32> to vector<16x8xf32>
    %85 = arith.truncf %84 : vector<16x8xf32> to vector<16x8xbf16>
    "tpu.trace_start"() <{level = 10 : i32, message = "ld,sd->ls"}> : () -> ()
    %cst_32 = arith.constant dense<0.000000e+00> : vector<8x16xf32>
    %86 = tpu.matmul %81, %83, %cst_32 {dimension_numbers = #tpu.dot_dimension_numbers<[1], [1], [0], [0], [0, 0, 1, 0], [], []>} : vector<8x8xbf16>, vector<16x8xbf16>, vector<8x16xf32> -> vector<8x16xf32>
    "tpu.trace_stop"() : () -> ()
    %87 = arith.addf %86, %6 : vector<8x16xf32>
    %cst_33 = arith.constant dense<0xFF800000> : vector<8xf32>
    %88 = vector.multi_reduction <maximumf>, %87, %cst_33 [1] : vector<8x16xf32> to vector<8xf32>
    %89 = vector.shape_cast %88 : vector<8xf32> to vector<8x1xf32>
    %90 = vector.broadcast %89 : vector<8x1xf32> to vector<8x16xf32>
    %91 = arith.subf %87, %90 : vector<8x16xf32>
    %92 = math.exp %91 : vector<8x16xf32>
    %cst_34 = arith.constant dense<0.000000e+00> : vector<8xf32>
    %93 = vector.multi_reduction <add>, %92, %cst_34 [1] : vector<8x16xf32> to vector<8xf32>
    %94 = vector.shape_cast %93 : vector<8xf32> to vector<8x1xf32>
    %95 = tpu.reciprocal %94 {approx = true} : vector<8x1xf32> -> vector<8x1xf32>
    %96 = vector.broadcast %95 : vector<8x1xf32> to vector<8x16xf32>
    %97 = arith.mulf %92, %96 : vector<8x16xf32>
    %98 = arith.truncf %97 : vector<8x16xf32> to vector<8x16xbf16>
    %cst_35 = arith.constant dense<0.000000e+00> : vector<8x8xf32>
    %99 = tpu.matmul %98, %85, %cst_35 {dimension_numbers = #tpu.dot_dimension_numbers<[1], [0], [0], [1], [0, 0, 1, 1], [], []>} : vector<8x16xbf16>, vector<16x8xbf16>, vector<8x8xf32> -> vector<8x8xf32>
    %c0_36 = arith.constant 0 : index
    %c24 = arith.constant 24 : index
    %100 = vector.load %arg13[%c0_36, %c24] : memref<8x32xf32, #tpu.memory_space<vmem>>, vector<8x8xf32>
    tpu.vector_store %arg13[%c0_36, %c24], %99 {strides = array<i32>} : memref<8x32xf32, #tpu.memory_space<vmem>>, vector<8x8xf32>,
    %c0_37 = arith.constant 0 : index
    %c0_38 = arith.constant 0 : index
    %101 = vector.load %arg13[%c0_37, %c0_38] : memref<8x32xf32, #tpu.memory_space<vmem>>, vector<8x32xf32>
    %102 = arith.truncf %101 : vector<8x32xf32> to vector<8x32xbf16>
    %c0_39 = arith.constant 0 : index
    %c0_40 = arith.constant 0 : index
    %103 = vector.load %arg8[%c0_39, %c0_40] : memref<32x32xbf16, #tpu.memory_space<vmem>>, vector<32x32xbf16>
    %cst_41 = arith.constant dense<0.000000e+00> : vector<8x32xf32>
    %104 = tpu.matmul %102, %103, %cst_41 {dimension_numbers = #tpu.dot_dimension_numbers<[1], [0], [0], [1], [0, 0, 1, 1], [], []>} : vector<8x32xbf16>, vector<32x32xbf16>, vector<8x32xf32> -> vector<8x32xf32>
    %c0_42 = arith.constant 0 : index
    %c0_43 = arith.constant 0 : index
    %105 = vector.load %arg9[%c0_42, %c0_43] : memref<1x32xf32, #tpu.memory_space<vmem>>, vector<1x32xf32>
    %106 = vector.broadcast %105 : vector<1x32xf32> to vector<8x32xf32>
    %107 = arith.addf %104, %106 : vector<8x32xf32>
    %108 = arith.addf %107, %1 : vector<8x32xf32>
    %cst_44 = arith.constant dense<0.000000e+00> : vector<8xf32>
    %109 = vector.multi_reduction <add>, %108, %cst_44 [1] : vector<8x32xf32> to vector<8xf32>
    %110 = vector.shape_cast %109 : vector<8xf32> to vector<8x1xf32>
    %cst_45 = arith.constant 3.200000e+01 : f32
    %111 = vector.broadcast %cst_45 : f32 to vector<8x1xf32>
    %112 = arith.divf %110, %111 : vector<8x1xf32>
    %113 = vector.broadcast %112 : vector<8x1xf32> to vector<8x32xf32>
    %114 = arith.subf %108, %113 : vector<8x32xf32>
    %115 = arith.mulf %114, %114 : vector<8x32xf32>
    %cst_46 = arith.constant dense<0.000000e+00> : vector<8xf32>
    %116 = vector.multi_reduction <add>, %115, %cst_46 [1] : vector<8x32xf32> to vector<8xf32>
    %117 = vector.shape_cast %116 : vector<8xf32> to vector<8x1xf32>
    %cst_47 = arith.constant 3.200000e+01 : f32
    %118 = vector.broadcast %cst_47 : f32 to vector<8x1xf32>
    %119 = arith.divf %117, %118 : vector<8x1xf32>
    %120 = vector.broadcast %112 : vector<8x1xf32> to vector<8x32xf32>
    %121 = arith.subf %108, %120 : vector<8x32xf32>
    %cst_48 = arith.constant 9.99999974E-6 : f32
    %122 = vector.broadcast %cst_48 : f32 to vector<8x1xf32>
    %123 = arith.addf %119, %122 : vector<8x1xf32>
    %124 = math.rsqrt %123 : vector<8x1xf32>
    %125 = vector.broadcast %124 : vector<8x1xf32> to vector<8x32xf32>
    %126 = arith.mulf %121, %125 : vector<8x32xf32>
    %c0_49 = arith.constant 0 : index
    %c0_50 = arith.constant 0 : index
    %127 = vector.load %arg10[%c0_49, %c0_50] : memref<1x32xf32, #tpu.memory_space<vmem>>, vector<1x32xf32>
    %128 = vector.broadcast %127 : vector<1x32xf32> to vector<8x32xf32>
    %129 = arith.mulf %126, %128 : vector<8x32xf32>
    %c0_51 = arith.constant 0 : index
    %c0_52 = arith.constant 0 : index
    %130 = vector.load %arg11[%c0_51, %c0_52] : memref<1x32xf32, #tpu.memory_space<vmem>>, vector<1x32xf32>
    %131 = vector.broadcast %130 : vector<1x32xf32> to vector<8x32xf32>
    %132 = arith.addf %129, %131 : vector<8x32xf32>
    %c0_53 = arith.constant 0 : index
    %c0_54 = arith.constant 0 : index
    %c0_55 = arith.constant 0 : index
    %133 = vector.load %arg12[%c0_53, %c0_54, %c0_55] : memref<1x8x32xf32, #tpu.memory_space<vmem>>, vector<1x8x32xf32>
    %134 = vector.shape_cast %133 : vector<1x8x32xf32> to vector<8x32xf32>
    %135 = vector.shape_cast %132 : vector<8x32xf32> to vector<1x8x32xf32>
    tpu.vector_store %arg12[%c0_53, %c0_54, %c0_55], %135 {strides = array<i32>} : memref<1x8x32xf32, #tpu.memory_space<vmem>>, vector<1x8x32xf32>,
    return
  }
  func.func @transform_0(%arg0: i32) -> (i32, i32, i32) {
    %c0_i32 = arith.constant 0 : i32
    %c0_i32_0 = arith.constant 0 : i32
    %c0_i32_1 = arith.constant 0 : i32
    return %arg0, %c0_i32, %c0_i32_0 : i32, i32, i32
  }
  func.func @transform_1(%arg0: i32) -> (i32, i32, i32) {
    %c0_i32 = arith.constant 0 : i32
    %c0_i32_0 = arith.constant 0 : i32
    %c0_i32_1 = arith.constant 0 : i32
    return %arg0, %c0_i32, %c0_i32_0 : i32, i32, i32
  }
  func.func @transform_2(%arg0: i32) -> (i32, i32) {
    %c0_i32 = arith.constant 0 : i32
    %c0_i32_0 = arith.constant 0 : i32
    %c0_i32_1 = arith.constant 0 : i32
    return %c0_i32, %c0_i32_0 : i32, i32
  }
  func.func @transform_3(%arg0: i32) -> (i32, i32) {
    %c0_i32 = arith.constant 0 : i32
    %c0_i32_0 = arith.constant 0 : i32
    %c0_i32_1 = arith.constant 0 : i32
    return %c0_i32, %c0_i32_0 : i32, i32
  }
  func.func @transform_4(%arg0: i32) -> (i32, i32) {
    %c0_i32 = arith.constant 0 : i32
    %c0_i32_0 = arith.constant 0 : i32
    %c0_i32_1 = arith.constant 0 : i32
    return %c0_i32, %c0_i32_0 : i32, i32
  }
  func.func @transform_5(%arg0: i32) -> (i32, i32) {
    %c0_i32 = arith.constant 0 : i32
    %c0_i32_0 = arith.constant 0 : i32
    %c0_i32_1 = arith.constant 0 : i32
    return %c0_i32, %c0_i32_0 : i32, i32
  }
  func.func @transform_6(%arg0: i32) -> (i32, i32) {
    %c0_i32 = arith.constant 0 : i32
    %c0_i32_0 = arith.constant 0 : i32
    %c0_i32_1 = arith.constant 0 : i32
    return %c0_i32, %c0_i32_0 : i32, i32
  }
  func.func @transform_7(%arg0: i32) -> (i32, i32) {
    %c0_i32 = arith.constant 0 : i32
    %c0_i32_0 = arith.constant 0 : i32
    %c0_i32_1 = arith.constant 0 : i32
    return %c0_i32, %c0_i32_0 : i32, i32
  }
  func.func @transform_8(%arg0: i32) -> (i32, i32) {
    %c0_i32 = arith.constant 0 : i32
    %c0_i32_0 = arith.constant 0 : i32
    %c0_i32_1 = arith.constant 0 : i32
    return %c0_i32, %c0_i32_0 : i32, i32
  }
  func.func @transform_9(%arg0: i32) -> (i32, i32) {
    %c0_i32 = arith.constant 0 : i32
    %c0_i32_0 = arith.constant 0 : i32
    %c0_i32_1 = arith.constant 0 : i32
    return %c0_i32, %c0_i32_0 : i32, i32
  }
  func.func @transform_10(%arg0: i32) -> (i32, i32) {
    %c0_i32 = arith.constant 0 : i32
    %c0_i32_0 = arith.constant 0 : i32
    %c0_i32_1 = arith.constant 0 : i32
    return %c0_i32, %c0_i32_0 : i32, i32
  }
  func.func @transform_11(%arg0: i32) -> (i32, i32, i32) {
    %c0_i32 = arith.constant 0 : i32
    %c0_i32_0 = arith.constant 0 : i32
    %c0_i32_1 = arith.constant 0 : i32
    return %arg0, %c0_i32, %c0_i32_0 : i32, i32, i32
  }
}

</mosaic_0001>

<bundles_post_ra>
// kernel: tpu_custom_call.1
= control target key start
LH: loop header
LB: loop body
LE: loop exit
PB: predicated region body
PF: predicated region fallthrough
CT: control target
= control target key end

     0   :  { %s2214_s0 = inlined_call_operand.hbm [shape: f32[2,8,32], index: 0, kind: input, shape index: {}]   ;;  %s2215_s1 = inlined_call_operand.hbm [shape: bf16[2,16,32], index: 1, kind: input, shape index: {}]   ;;  %s2216_s2 = inlined_call_operand.vmem [shape: bf16[8,16], index: 2, kind: input, shape index: {}]   ;;  %s2217_s3 = inlined_call_operand.hbm [shape: bf16[32,32], index: 3, kind: input, shape index: {}]   ;;  %s2218_s4 = inlined_call_operand.hbm [shape: bf16[32,64], index: 4, kind: input, shape index: {}]   ;;  %s2219_s5 = inlined_call_operand.vmem [shape: f32[1,32], index: 5, kind: input, shape index: {}]   ;;  %s2220_s6 = inlined_call_operand.vmem [shape: f32[1,64], index: 6, kind: input, shape index: {}]   ;;  %s2221_s7 = inlined_call_operand.vmem [shape: bf16[32,32], index: 7, kind: input, shape index: {}]   ;;  %s2222_s8 = inlined_call_operand.vmem [shape: f32[1,32], index: 8, kind: input, shape index: {}]   ;;  %s2223_s9 = inlined_call_operand.vmem [shape: f32[1,32], index: 9, kind: input, shape index: {}]   ;;  %s2224_s10 = inlined_call_operand.vmem [shape: f32[1,32], index: 10, kind: input, shape index: {}]   ;;  %s2225_s11 = inlined_call_operand.hbm [shape: f32[2,8,32], index: 11, kind: output, shape index: {}]  }
   0x1   :  { %2237 = sst [smem:[#allocation22_spill]] %s2217_s3 }
   0x2   :  { %2238 = sst [smem:[#allocation23_spill]] %s2218_s4 }
   0x3   :  { %2239 = sst [smem:[#allocation24_spill]] %s2225_s11 }
   0x4   :  { %16 = vsyncpa [#allocation4], 0 }
   0x5   :  { %18 = vsyncpa [#allocation4 + $0x1], 0 }
   0x6   :  { %19 = vsyncpa [#allocation7], 0 }
   0x7   :  { %21 = vsyncpa [#allocation7 + $0x1], 0 }
   0x8   :  { %22 = vsyncpa [#allocation10], 0 }
   0x9   :  { %23 = vsyncpa [#allocation5], 0 }
   0xa   :  { %25 = vsyncpa [#allocation5 + $0x1], 0  ;;  %s1823_s17 = smov 0   ;;  %s1825_s18 = smov 0  }
   0xb   :  { %s1827_s19 = smov 0   ;;  %s1829_s20 = smov 0  }
   0xc LB: > { %2240 = sst [smem:[#allocation17_spill]] %s1730_s17  ;;  %s1844_s21 = sadd.s32 4294967295, %s1742_s20   ;;  %s1742_s20 = sphi %s1829_s20, %s2267_s20   ;;  %s1738_s19 = sphi %s1827_s19, %s2269_s19   ;;  %s1734_s18 = sphi %s1825_s18, %s2271_s18   ;;  %s1730_s17 = sphi %s1823_s17, %s2270_s17  }
   0xd   : > { %2241 = sst [smem:[#allocation18_spill]] %s1738_s19  ;;  %s1296_s22 = sadd.s32 4294967294, %s1742_s20  }
   0xe   : > { %p51_p0 = scmp.ne.s32.totalorder %s1734_s18, %s1730_s17  ;;  %p2226_p1 = scmp.eq.s32.totalorder %s1844_s21, 0 }
   0xf   : > { %p296_p3 = scmp.eq.s32.totalorder %s1296_s22, 1  ;;  %p1297_p5 = scmp.ge.s32.totalorder %s1742_s20, 1 }
  0x10   : > { %p1853_p4 = por %p2226_p1, %p51_p0  ;;  %p303_p7 = scmp.lt.s32.totalorder %s1742_s20, 3 }
  0x11   : > { %p1858_p6 = por %p296_p3, %p51_p0  ;;  %s1744_s26 = smov [#allocation8]  }
  0x12   : > { %s2242_s23 = scalar_select %p1853_p4, 1, 0 }
  0x13   : > { %s2243_s24 = scalar_select %p1858_p6, 1, 0 }
  0x14   : > { %p1863_p8 = pnand %p1297_p5, %p303_p7  ;;  %s318_s27 = sshll.u32 %s1744_s26, 4  ;;  %s1867_s27 = int_to_ptr.vmem [resolvable:$true] %s318_s27 }
  0x15   : > { %2244 = sst [smem:[#allocation19_spill]] %s2243_s24  ;;  %s1745_s29 = smov [#allocation9]  }
  0x16   : > { %p1451_p9 = pneg %p1863_p8  ;;  %s331_s30 = sshll.u32 %s1745_s29, 4  ;;  %s1878_s30 = int_to_ptr.vmem [resolvable:$true] %s331_s30 }
  0x17   : > { %s2247_s3 = sld [smem:[#allocation22_spill]] }
  0x18   : > { %p1874_p11 = pnand %p1451_p9, %p2226_p1 }
  0x1a   : > { %p1550_p13 = pneg %p1874_p11 }
  0x1d   : > { %s1548_s14 = scalar_lea.hbm %s2247_s3, 256 }
  0x1e   : > { %p1549_p12 = scmp.ne.s32.totalorder %s2247_s3, %s1548_s14  ;;  %p1555_p5 = scmp.lt.u32.totalorder %s1548_s14, %s2247_s3 }
  0x20   : > { %p1551_p0 = pnand %p1550_p13, %p1549_p12 }
  0x22   : > { %p1552_p3 = pneg %p1551_p0 }
  0x24   : > { %p1557_p7 = pnand %p1555_p5, %p1552_p3 }
  0x26   : > { %1560 = shalt.err (!%p1557_p7)
}
  0x27   : > { %s1561_s29 = scalar_lea.vmem %s1867_s27, 256  ;;  %p1569_p2 = scmp.lt.s32.totalorder %s1867_s27, %s1867_s27 }
  0x28   : > { %p1562_p9 = scmp.ne.s32.totalorder %s1867_s27, %s1561_s29  ;;  %p1570_p12 = scmp.lt.s32.totalorder %s1561_s29, %s1561_s29 }
  0x2a   : > { %p1564_p10 = pnand %p1562_p9, %p1550_p13  ;;  %p1571_p0 = por %p1570_p12, %p1569_p2 }
  0x2c   : > { %p1565_p1 = pneg %p1564_p10 }
  0x2e   : > { %p1572_p6 = pnand %p1571_p0, %p1565_p1 }
  0x30   : > { %1575 = shalt.err (!%p1572_p6)
}
  0x31   : > { %s2230_s12 = smov 64   ;;  %s2231_s13 = smov 4  }
  0x32   : > { %1454 = dma.hbm_to_vmem [thread:$0]  (!%p1874_p11), %s2247_s3, 256, %s1867_s27, [#allocation7], %s2230_s12, %s2230_s12, %s2231_s13  }
  0x33   : > { %s2248_s4 = sld [smem:[#allocation23_spill]] }
  0x39   : > { %s1576_s26 = scalar_lea.hbm %s2248_s4, 256 }
  0x3a   : > { %p1577_p1 = scmp.ne.s32.totalorder %s2248_s4, %s1576_s26  ;;  %p1583_p10 = scmp.lt.u32.totalorder %s1576_s26, %s2248_s4 }
  0x3c   : > { %p1579_p2 = pnand %p1577_p1, %p1550_p13 }
  0x3e   : > { %p1580_p6 = pneg %p1579_p2 }
  0x40   : > { %p1585_p3 = pnand %p1583_p10, %p1580_p6 }
  0x42   : > { %1588 = shalt.err (!%p1585_p3)
}
  0x43   : > { %s1589_s27 = scalar_lea.vmem %s1878_s30, 256  ;;  %p1597_p12 = scmp.lt.s32.totalorder %s1878_s30, %s1878_s30 }
  0x44   : > { %p1590_p5 = scmp.ne.s32.totalorder %s1878_s30, %s1589_s27  ;;  %p1598_p0 = scmp.lt.s32.totalorder %s1589_s27, %s1589_s27 }
  0x46   : > { %p1592_p7 = pnand %p1590_p5, %p1550_p13  ;;  %p1599_p1 = por %p1598_p0, %p1597_p12 }
  0x48   : > { %p1593_p9 = pneg %p1592_p7 }
  0x4a   : > { %p1600_p2 = pnand %p1599_p1, %p1593_p9 }
  0x4c   : > { %1603 = shalt.err (!%p1600_p2)
}
  0x4d   : > { %1457 = dma.hbm_to_vmem [thread:$0]  (!%p1874_p11), %s2248_s4, 256, %s1878_s30, [#allocation10], %s2230_s12, %s2230_s12, %s2231_s13  }
  0x4e   : > { %s1939_s24 = sadd.s32 1, %s1742_s20   ;;  %s38_s28 = sadd.s32 1, %s1738_s19 }
  0x4f   : > { %2249 = sst [smem:[#allocation20_spill]] %s1939_s24  ;;  %s35_s14 = ssub.s32 %s1742_s20, %s1939_s24 }
  0x50   : > { %p45_p13 = scmp.ne.s32.totalorder %s1738_s19, %s1734_s18  ;;  %p36_p6 = scmp.eq.s32.totalorder %s35_s14, 0 }
  0x51   : > { %p46_p10 = scmp.eq.s32.totalorder %s1742_s20, 0  ;;  %p2250_p3 = scmp.eq.s32.totalorder %s1844_s21, 1 }
  0x52   : > { %p1471_p7 = scmp.lt.s32.totalorder %s1742_s20, 2  ;;  %s363_s22 = sand.u32 1, %s1738_s19  }
  0x53   : > { %p1949_p5 = por %p2250_p3, %p45_p13  ;;  %p47_p9 = por %p46_p10, %p45_p13 }
  0x54   : > { %s1955_s16 = scalar_select %p36_p6, %s1738_s19, %s38_s28  }
  0x55   : > { %s2251_s15 = scalar_select %p1949_p5, 1, 0 }
  0x56   : > { %2252 = sst [smem:[#allocation21_spill]] %s1955_s16  ;;  %s1301_s26 = sshll.u32 %s363_s22, 3 }
  0x57   : > { %s1302_s30 = sshll.u32 %s1742_s20, 7  ;;  %s367_s17 = scalar_lea.vmem [#allocation3], %s1301_s26 }
  0x58   : > { %s1962_s11 = scalar_lea.hbm %s2214_s0, %s1302_s30  ;;  %s374_s14 = sshll.u32 %s367_s17, 4  ;;  %s1964_s14 = int_to_ptr.vmem [resolvable:$true] %s374_s14 }
  0x59   : > { %p1966_p11 = pnand %p1471_p7, %p47_p9  ;;  %s1973_s29 = scalar_lea.hbm %s2215_s1, %s1302_s30 }
  0x5a   : > { %s385_s27 = scalar_lea.vmem [#allocation6], %s1301_s26  ;;  %s364_s4 = scalar_lea.sflag [#allocation4], %s363_s22 }
  0x5b   : > { %s1975_s3 = sshll.u32 %s385_s27, 4  ;;  %s1604_s16 = scalar_lea.hbm %s1962_s11, 128  ;;  %s2003_s3 = int_to_ptr.vmem [resolvable:$true] %s1975_s3 }
  0x5c   : > { %p1605_p12 = scmp.ne.s32.totalorder %s1962_s11, %s1604_s16  ;;  %p1606_p0 = pneg %p1966_p11 }
  0x5d   : > { %s1609_s12 = scalar_lea.hbm %s2214_s0, 256  ;;  %p1610_p13 = scmp.lt.u32.totalorder %s1962_s11, %s2214_s0 }
  0x5e   : > { %p1607_p1 = pnand %p1606_p0, %p1605_p12  ;;  %p1611_p6 = scmp.lt.u32.totalorder %s1609_s12, %s1604_s16 }
  0x5f   : > { %p1613_p3 = scmp.lt.u32.totalorder %s1604_s16, %s1962_s11 }
  0x60   : > { %p1608_p2 = pneg %p1607_p1  ;;  %p1612_p10 = por %p1611_p6, %p1610_p13 }
  0x62   : > { %p1614_p7 = por %p1613_p3, %p1612_p10 }
  0x64   : > { %p1615_p9 = pnand %p1614_p7, %p1608_p2 }
  0x66   : > { %1618 = shalt.err (!%p1615_p9)
}
  0x67   : > { %s1619_s22 = scalar_lea.vmem %s1964_s14, 128  ;;  %s1748_s19 = smov [#allocation3]  }
  0x68   : > { %p1620_p12 = scmp.ne.s32.totalorder %s1964_s14, %s1619_s22  ;;  %s1624_s26 = sshll.u32 %s1748_s19, 4  ;;  %s1625_s26 = int_to_ptr.vmem [resolvable:$false] %s1624_s26 }
  0x69   : > { %s1626_s24 = scalar_lea.vmem %s1625_s26, 256  ;;  %p1627_p4 = scmp.lt.s32.totalorder %s1964_s14, %s1625_s26 }
  0x6a   : > { %p1622_p1 = pnand %p1620_p12, %p1606_p0  ;;  %p1628_p13 = scmp.lt.s32.totalorder %s1626_s24, %s1619_s22 }
  0x6c   : > { %p1623_p5 = pneg %p1622_p1  ;;  %p1629_p6 = por %p1628_p13, %p1627_p4 }
  0x6e   : > { %p1630_p10 = pnand %p1629_p6, %p1623_p5 }
  0x70   : > { %1633 = shalt.err (!%p1630_p10)
}
  0x71   : > { %1461 = dma.hbm_to_vmem [thread:$0]  (!%p1966_p11), %s1962_s11, 128, %s1964_s14, %s364_s4  }
  0x72   : > { %s381_s16 = sand.u32 1, %s1742_s20   ;;  %s1634_s27 = scalar_lea.hbm %s1973_s29, 128 }
  0x73   : > { %s2006_s30 = scalar_lea.sflag [#allocation7], %s381_s16  ;;  %p1635_p4 = scmp.ne.s32.totalorder %s1973_s29, %s1634_s27 }
  0x74   : > { %s1639_s13 = scalar_lea.hbm %s2215_s1, 256  ;;  %p1640_p3 = scmp.lt.u32.totalorder %s1973_s29, %s2215_s1 }
  0x75   : > { %p1637_p5 = pnand %p1635_p4, %p1606_p0  ;;  %p1641_p7 = scmp.lt.u32.totalorder %s1639_s13, %s1634_s27 }
  0x76   : > { %p1643_p12 = scmp.lt.u32.totalorder %s1634_s27, %s1973_s29 }
  0x77   : > { %p1638_p2 = pneg %p1637_p5  ;;  %p1642_p9 = por %p1641_p7, %p1640_p3 }
  0x79   : > { %p1644_p1 = por %p1643_p12, %p1642_p9 }
  0x7b   : > { %p1645_p13 = pnand %p1644_p1, %p1638_p2 }
  0x7d   : > { %1648 = shalt.err (!%p1645_p13)
}
  0x7e   : > { %s1649_s4 = scalar_lea.vmem %s2003_s3, 128  ;;  %s1749_s11 = smov [#allocation6]  }
  0x7f   : > { %p1650_p6 = scmp.ne.s32.totalorder %s2003_s3, %s1649_s4  ;;  %s1654_s14 = sshll.u32 %s1749_s11, 4  ;;  %s1655_s14 = int_to_ptr.vmem [resolvable:$false] %s1654_s14 }
  0x80   : > { %s1656_s26 = scalar_lea.vmem %s1655_s14, 256  ;;  %p1657_p5 = scmp.lt.s32.totalorder %s2003_s3, %s1655_s14 }
  0x81   : > { %p1652_p10 = pnand %p1650_p6, %p1606_p0  ;;  %p1658_p3 = scmp.lt.s32.totalorder %s1656_s26, %s1649_s4 }
  0x83   : > { %p1653_p4 = pneg %p1652_p10  ;;  %p1659_p7 = por %p1658_p3, %p1657_p5 }
  0x85   : > { %p1660_p9 = pnand %p1659_p7, %p1653_p4 }
  0x87   : > { %1663 = shalt.err (!%p1660_p9)
}
  0x88   : > { %s2254_s24 = smov 4   ;;  %s2255_s16 = smov 64  }
  0x89   : > { %1464 = dma.hbm_to_vmem [thread:$0]  (!%p1966_p11), %s1973_s29, 128, %s2003_s3, %s2006_s30, %s2255_s16, %s2255_s16, %s2254_s24  }
  0x8a   : > { %404 = sbr.rel (%p1863_p8) target bundleno = 1940 (0x794), region = 64  ;;  %s2038_s27 = sand.u32 (!%p1863_p8), 1, %s1734_s18  }
  0x8b   : > { %s2041_s17 = sshll.u32 (!%p1863_p8), %s2038_s27, 3  ;;  %s407_s28 = scalar_lea.sflag (!%p1863_p8), [#allocation4], %s2038_s27 }
  0x8c   : > { %s410_s12 = scalar_lea.vmem (!%p1863_p8), [#allocation3], %s2041_s17  ;;  %p2256_p0 = scmp.ne.s32.totalorder (!%p1863_p8), %s2242_s23, 0 }
  0x91   : > { %1709 = dma.done.wait (%p2256_p0), %s407_s28, 128  }
  0x92   : > { %1711 = vsyncadd (%p2256_p0), %s407_s28, 4294967168  ;;  %s415_s3 = sand.u32 1, %s1844_s21   ;;  %s419_s29 = scalar_lea.vmem [#allocation6], %s2041_s17 }
  0x93   : > { %s416_s25 = scalar_lea.sflag [#allocation7], %s415_s3 }
  0x94   : > { %1713 = dma.done.wait (%p2256_p0), %s416_s25, 128  }
  0x95   : > { %1715 = vsyncadd (%p2256_p0), %s416_s25, 4294967168  ;;  %p2257_p8 = scmp.eq.s32.totalorder %s1844_s21, 0 }
  0x97   : > { %1717 = dma.done.wait (%p2257_p8), [#allocation7], 256   ;;  %p2258_p11 = pmov %p2257_p8 }
  0x98   : > { %p2259_p2 = pmov %p2257_p8 }
  0x99   : > { %1719 = vsyncadd (%p2258_p11), [#allocation7], 4294967040 }
  0x9a   : > { %1721 = dma.done.wait (%p2259_p2), [#allocation10], 256   ;;  %p2260_p12 = pmov %p2259_p2 }
  0x9b   : > { %v1750_v0 = vmov 0.0   ;;  %vm1751_vm0 = vmmov 0   ;;  %v1523_v1 = vld [vmem:[#allocation9] sm:$0xff]   ;;  %v1524_v2 = vld [vmem:[#allocation9 + $0x8] sm:$0xff]   ;;  %v1525_v3 = vld [vmem:[#allocation8] sm:$0xff]   ;;  %vm501_vm1 = vcmask 261120  }
  0x9c   : > { %1723 = vsyncadd (%p2260_p12), [#allocation10], 4294967040  ;;  %1373 = vmatprep.subr.bf16.mxu1 %v1750_v0  ;;  %1365 = vmatprep.subr.bf16.mxu0 %v1750_v0  ;;  %v1527_v4 = vld [vmem:[#allocation8 + $0x8] sm:$0xff]   ;;  %v1526_v5 = vld [vmem:[%s419_s29] sm:$0xff]   ;;  %vm619_vm2 = vcmask 64512   ;;  %s1752_s19 = smov 112  }
  0x9d   : > { %1377 = vmatprep.mubr.msk.bf16.mxu1 %vm1751_vm0, %v1750_v0  ;;  %1369 = vmatprep.mubr.msk.bf16.mxu0 %vm1751_vm0, %v1750_v0  ;;  %v2071_v6 = vld [vmem:[%s410_s12] sm:$0xff]  ;;  %v1316_v8 = vld [vmem:[%s2220_s6] ss:$0 sm:$0xff]  ;;  %s1753_s4 = smov 120   ;;  %s1754_s11 = smov 104   ;;  %vm666_vm3 = vcmask 130048  }
  0x9e   : > { %1374 = vmatpush3.bf16.msra.mxu1 %v1523_v1  ;;  %1366 = vmatpush3.bf16.msra.mxu0 %v1525_v3  ;;  %v473_v7 = vpack.c.bf16 %v2071_v6, %v2071_v6  ;;  %v1312_v10 = vld [vmem:[%s2219_s5] ss:$0 sm:$0xff]  ;;  %s1755_s24 = smov 96   ;;  %s1756_s16 = smov 80   ;;  %vm840_vm4 = vcmask 130112   ;;  %vm954_vm5 = vcmask 195712  }
  0x9f   : > { %1375 = vmatprep.subr.bf16.mxu1 %v1750_v0  ;;  %1367 = vmatprep.subr.bf16.mxu0 %v1750_v0  ;;  %v476_v33 = vld [vmem:[%s2216_s2] sm:$0xf]  ;;  %s1757_s28 = smov 72   ;;  %s1758_s12 = smov 88   ;;  %vm1068_vm6 = vcmask 261312  }
  0xa0   : > { %v477_v34 = vunpack.c.l.bf16 %v476_v33  ;;  %s1759_s3 = smov 8   ;;  %s1760_s13 = smov 16  }
  0xa1   : > { %s1761_s22 = smov 24   ;;  %s2261_s29 = sld [smem:[#allocation24_spill]] }
  0xa2   : > { %1376 = vmatpush3.bf16.msra.mxu1 %v1524_v2  ;;  %1368 = vmatpush3.bf16.msra.mxu0 %v1527_v4  ;;  %s1171_s30 = scalar_lea.sflag [#allocation5], %s2038_s27  ;;  %p2262_p13 = scmp.ne.s32.totalorder %s2251_s15, 0 }
  0xa3   : > { %1387 = vmatprep.subr.bf16.mxu1 %v1750_v0  ;;  %1381 = vmatprep.subr.bf16.mxu0 %v1750_v0 }
  0xa5   : > { %1378 = vmatmul.mubr.msk.bf16.vlgmr.msra.gmra.mrb[0].mxu1 %vm501_vm1, %v1526_v5  ;;  %1370 = vmatmul.mubr.msk.bf16.vlgmr.msra.gmra.mrb[0].mxu0 %vm501_vm1, %v473_v7 }
  0xa6   : > { %1389 = vmatprep.mubr.msk.bf16.mxu1 %vm1751_vm0, %v1750_v0  ;;  %1383 = vmatprep.mubr.msk.bf16.mxu0 %vm1751_vm0, %v1750_v0 }
 0x178   : > { %v610_v9 = vpop.f32.mrb[0].mxu1  ;;  %v539_v13 = vpop.f32.mrb[0].mxu0 }
 0x179   : > { %v1379_v11 = vpop.f32.mrb[1].mxu1  ;;  %v611_v14 = vadd.f32 %v1316_v8, %v610_v9  ;;  %v540_v17 = vadd.f32 %v1312_v10, %v539_v13  ;;  %v1371_v18 = vpop.f32.mrb[1].mxu0 }
 0x17a   : > { %v613_v12 = vpop.f32.mrb[2].mxu1  ;;  %v542_v19 = vpop.f32.mrb[2].mxu0 }
 0x17b   : > { %v614_v15 = vadd.f32 %v1316_v8, %v613_v12  ;;  %v1380_v16 = vpop.f32.mrb[3].mxu1  ;;  %v1372_v21 = vpop.f32.mrb[3].mxu0  ;;  %v617_v22 = vpack.c.bf16 %v540_v17, %v540_v17 }
 0x17d   : > { %v2089_v20 = vpack.c.bf16 %v614_v15, %v611_v14 }
 0x17f   : > { %844 = vrot.lane.b32.xlu1 %v2089_v20, %s1752_s19  ;;  %730 = vrot.lane.b32.xlu0 %v2089_v20, %s1753_s4  ;;  %v624_v23 = vsel %vm619_vm2, %v2089_v20, 0 }
 0x180   : > { %1382 = vmatpush3.bf16.xpose.msra.mxu0 %v624_v23 }
 0x181   : > { %1393 = vmatprep.subr.bf16.mxu0 %v1750_v0 }
 0x183   : > { %842 = vrot.lane.b32.xlu1 %v617_v22, %s1752_s19  ;;  %728 = vrot.lane.b32.xlu0 %v617_v22, %s1753_s4 }
 0x187   : > { %956 = vrot.lane.b32.xlu1 %v617_v22, %s1754_s11  ;;  %958 = vrot.lane.b32.xlu0 %v2089_v20, %s1754_s11 }
 0x188   : > { %1384 = vmatmul.mubr.msk.bf16.vlgmr.msra.gmra.mrb[4].mxu0 %vm619_vm2, %v617_v22 }
 0x189   : > { %1395 = vmatprep.mubr.msk.bf16.mxu0 %vm1751_vm0, %v1750_v0 }
 0x1f1   : > { %v731_v24 = vpop.permute.xlu0 %730  ;;  %v845_v26 = vpop.permute.xlu1 %844 }
 0x1f2   : > { %v736_v25 = vsel %vm619_vm2, %v731_v24, 0  ;;  %v850_v28 = vsel %vm619_vm2, %v845_v26, 0 }
 0x1f3   : > { %1394 = vmatpush3.bf16.xpose.msra.mxu0 %v736_v25 }
 0x1f4   : > { %1405 = vmatprep.subr.bf16.mxu0 %v1750_v0 }
 0x1f5   : > { %v729_v27 = vpop.permute.xlu0 %728  ;;  %v843_v30 = vpop.permute.xlu1 %842 }
 0x1f9   : > { %v959_v29 = vpop.permute.xlu0 %958  ;;  %v957_v32 = vpop.permute.xlu1 %956 }
 0x1fa   : > { %1396 = vmatmul.mubr.msk.bf16.vlgmr.msra.gmra.mrb[8].mxu0 %vm619_vm2, %v729_v27  ;;  %v964_v31 = vsel %vm619_vm2, %v959_v29, 0 }
 0x1fb   : > { %1406 = vmatpush3.bf16.xpose.msra.mxu0 %v850_v28  ;;  %1407 = vmatprep.mubr.msk.bf16.mxu0 %vm1751_vm0, %v1750_v0 }
 0x1fc   : > { %1417 = vmatprep.subr.bf16.mxu0 %v1750_v0 }
 0x202   : > { %1408 = vmatmul.mubr.msk.bf16.vlgmr.msra.gmra.mrb[12].mxu0 %vm619_vm2, %v843_v30 }
 0x203   : > { %1418 = vmatpush3.bf16.xpose.msra.mxu0 %v964_v31  ;;  %1419 = vmatprep.mubr.msk.bf16.mxu0 %vm1751_vm0, %v1750_v0 }
 0x204   : > { %1429 = vmatprep.subr.bf16.mxu0 %v1750_v0 }
 0x20a   : > { %1420 = vmatmul.mubr.msk.bf16.vlgmr.msra.gmra.mrb[16].mxu0 %vm619_vm2, %v957_v32 }
 0x20b   : > { %1433 = vmatprep.mubr.msk.bf16.mxu0 %vm1751_vm0, %v1750_v0 }
 0x25b   : > { %v660_v35 = vpop.f32.mrb[4].mxu0 }
 0x25c   : > { %v661_v36 = vadd.f32 %v660_v35, %v477_v34  ;;  %v1385_v37 = vpop.f32.mrb[5].mxu0 }
 0x25d   : > { %v663_v38 = vpop.f32.mrb[6].mxu0 }
 0x25e   : > { %v1386_v39 = vpop.f32.mrb[7].mxu0  ;;  %v667_v40 = vsel %vm666_vm3, %v661_v36, -inf }
 0x25f   : > { %668 = vmax.xlane.f32.xlu0 %v667_v40 }
 0x2cd   : > { %v772_v41 = vpop.f32.mrb[8].mxu0 }
 0x2ce   : > { %v773_v42 = vadd.f32 %v772_v41, %v477_v34  ;;  %v1397_v43 = vpop.f32.mrb[9].mxu0 }
 0x2cf   : > { %v775_v44 = vpop.f32.mrb[10].mxu0 }
 0x2d0   : > { %v1398_v45 = vpop.f32.mrb[11].mxu0  ;;  %v778_v46 = vsel %vm666_vm3, %v773_v42, -inf }
 0x2d1   : > { %779 = vmax.xlane.f32.xlu1 %v778_v46  ;;  %v1528_v45 = vld [vmem:[%s2221_s7] sm:$0xff]   ;;  %v1529_v46 = vld [vmem:[%s2221_s7 + $0x8] sm:$0xff]  }
 0x2d2   : > { %1430 = vmatpush3.bf16.msra.mxu0 %v1528_v45 }
 0x2d3   : > { %1431 = vmatprep.subr.bf16.mxu0 %v1750_v0 }
 0x2d5   : > { %v886_v47 = vpop.f32.mrb[12].mxu0 }
 0x2d6   : > { %v887_v48 = vadd.f32 %v886_v47, %v477_v34  ;;  %v1409_v49 = vpop.f32.mrb[13].mxu0  ;;  %1432 = vmatpush3.bf16.msra.mxu0 %v1529_v46 }
 0x2d7   : > { %v889_v50 = vpop.f32.mrb[14].mxu0 }
 0x2d8   : > { %v1410_v51 = vpop.f32.mrb[15].mxu0  ;;  %v892_v52 = vsel %vm666_vm3, %v887_v48, -inf }
 0x2d9   : > { %893 = vmax.xlane.f32.xlu0 %v892_v52 }
 0x2dd   : > { %v1000_v53 = vpop.f32.mrb[16].mxu0 }
 0x2de   : > { %v1001_v54 = vadd.f32 %v1000_v53, %v477_v34  ;;  %v1421_v55 = vpop.f32.mrb[17].mxu0 }
 0x2df   : > { %v1003_v56 = vpop.f32.mrb[18].mxu0 }
 0x2e0   : > { %v1422_v57 = vpop.f32.mrb[19].mxu0  ;;  %v1006_v58 = vsel %vm666_vm3, %v1001_v54, -inf }
 0x2e1   : > { %1007 = vmax.xlane.f32.xlu0 %v1006_v58 }
 0x2ec   : > { %v669_v59 = vpop.xlane.xlu0 %668 }
 0x2ed   : > { %v670_v60 = vsub.f32 %v661_v36, %v669_v59  ;;  %v1329_v59 = vld [vmem:[%s2222_s8] ss:$0 sm:$0xff] }
 0x2ef   : > { %v671_v61 = vmul.f32 1.442695, %v670_v60 }
 0x2f1   : > { %1530 = vpow2.f32 %v671_v61 }
 0x2fb   : > { %v1531_v62 = vpop.eup %1530 }
 0x2fc   : > { %v673_v63 = vsel %vm666_vm3, %v1531_v62, 0.0 }
 0x2fd   : > { %674 = vadd.xlane.f32.xlu1 %v673_v63 }
 0x30e   : > { %680 = vrot.lane.b32.xlu1 %v2089_v20, %s1755_s24 }
 0x35e   : > { %v780_v1 = vpop.xlane.xlu1 %779 }
 0x35f   : > { %v781_v2 = vsub.f32 %v773_v42, %v780_v1 }
 0x361   : > { %v782_v3 = vmul.f32 1.442695, %v781_v2 }
 0x363   : > { %1532 = vpow2.f32 %v782_v3 }
 0x366   : > { %v894_v4 = vpop.xlane.xlu0 %893 }
 0x367   : > { %v895_v5 = vsub.f32 %v887_v48, %v894_v4 }
 0x369   : > { %v896_v7 = vmul.f32 1.442695, %v895_v5 }
 0x36b   : > { %1534 = vpow2.f32 %v896_v7 }
 0x36d   : > { %v1533_v8 = vpop.eup %1532 }
 0x36e   : > { %v1008_v9 = vpop.xlane.xlu0 %1007  ;;  %v784_v10 = vsel %vm666_vm3, %v1533_v8, 0.0 }
 0x36f   : > { %v1009_v11 = vsub.f32 %v1001_v54, %v1008_v9  ;;  %785 = vadd.xlane.f32.xlu0 %v784_v10 }
 0x371   : > { %v1010_v12 = vmul.f32 1.442695, %v1009_v11 }
 0x373   : > { %1536 = vpow2.f32 %v1010_v12 }
 0x375   : > { %v1535_v13 = vpop.eup %1534 }
 0x376   : > { %v898_v14 = vsel %vm666_vm3, %v1535_v13, 0.0 }
 0x377   : > { %899 = vadd.xlane.f32.xlu1 %v898_v14 }
 0x37d   : > { %v1537_v15 = vpop.eup %1536 }
 0x37e   : > { %v1012_v16 = vsel %vm666_vm3, %v1537_v15, 0.0 }
 0x37f   : > { %1013 = vadd.xlane.f32.xlu0 %v1012_v16 }
 0x388   : > { %904 = vrot.lane.b32.xlu1 %v2089_v20, %s1756_s16  ;;  %s1336_s16 = sshll.u32 %s1844_s21, 7  ;;  %s1762_s21 = smov [#allocation11]  }
 0x389   : > { %s2169_s23 = scalar_lea.hbm %s2261_s29, %s1336_s16 }
 0x38a   : > { %v675_v17 = vpop.xlane.xlu1 %674 }
 0x38b   : > { %1538 = vrcp.f32 %v675_v17 }
 0x38c   : > { %1018 = vrot.lane.b32.xlu1 %v2089_v20, %s1757_s28  ;;  %s470_s28 = scalar_lea.vmem [#allocation11], %s2041_s17  ;;  %s1668_s17 = sshll.u32 %s1762_s21, 4  ;;  %s1669_s17 = int_to_ptr.vmem [resolvable:$false] %s1668_s17 }
 0x38e   : > { %v681_v18 = vpop.permute.xlu1 %680 }
 0x38f   : > { %1388 = vmatpush3.bf16.msra.mxu1 %v681_v18 }
 0x390   : > { %1399 = vmatprep.subr.bf16.mxu1 %v1750_v0 }
 0x395   : > { %v1539_v19 = vpop.eup %1538  ;;  %790 = vrot.lane.b32.xlu0 %v2089_v20, %s1758_s12  ;;  %s1184_s12 = sshll.u32 %s470_s28, 4  ;;  %s2171_s12 = int_to_ptr.vmem [resolvable:$true] %s1184_s12 }
 0x396   : > { %v677_v21 = vmul.f32 %v1539_v19, %v1531_v62  ;;  %p1671_p4 = scmp.lt.s32.totalorder %s2171_s12, %s1669_s17 }
 0x398   : > { %v678_v22 = vpack.c.bf16 %v677_v21, %v677_v21 }
 0x39a   : > { %1390 = vmatmul.mubr.msk.bf16.vlgmr.msra.gmra.mrb[4].mxu1 %vm666_vm3, %v678_v22 }
 0x39b   : > { %1401 = vmatprep.mubr.msk.bf16.mxu1 %vm1751_vm0, %v1750_v0 }
 0x3fc   : > { %v786_v23 = vpop.xlane.xlu0 %785 }
 0x3fd   : > { %1540 = vrcp.f32 %v786_v23 }
 0x404   : > { %v900_v24 = vpop.xlane.xlu1 %899 }
 0x405   : > { %1542 = vrcp.f32 %v900_v24 }
 0x407   : > { %v1541_v25 = vpop.eup %1540 }
 0x408   : > { %v788_v27 = vmul.f32 %v1541_v25, %v1533_v8  ;;  %v905_v30 = vpop.permute.xlu1 %904 }
 0x40a   : > { %v789_v29 = vpack.c.bf16 %v788_v27, %v788_v27 }
 0x40c   : > { %v1014_v26 = vpop.xlane.xlu0 %1013  ;;  %v1019_v34 = vpop.permute.xlu1 %1018 }
 0x40d   : > { %1544 = vrcp.f32 %v1014_v26 }
 0x40f   : > { %v1543_v20 = vpop.eup %1542 }
 0x410   : > { %v791_v28 = vpop.permute.xlu0 %790  ;;  %v902_v31 = vmul.f32 %v1543_v20, %v1535_v13 }
 0x411   : > { %1400 = vmatpush3.bf16.msra.mxu1 %v791_v28 }
 0x412   : > { %1411 = vmatprep.subr.bf16.mxu1 %v1750_v0  ;;  %v903_v32 = vpack.c.bf16 %v902_v31, %v902_v31 }
 0x414   : > { %1402 = vmatmul.mubr.msk.bf16.vlgmr.msra.gmra.mrb[8].mxu1 %vm666_vm3, %v789_v29 }
 0x415   : > { %1412 = vmatpush3.bf16.msra.mxu1 %v905_v30  ;;  %1413 = vmatprep.mubr.msk.bf16.mxu1 %vm1751_vm0, %v1750_v0 }
 0x416   : > { %1423 = vmatprep.subr.bf16.mxu1 %v1750_v0 }
 0x417   : > { %v1545_v33 = vpop.eup %1544 }
 0x418   : > { %v1016_v35 = vmul.f32 %v1545_v33, %v1537_v15  ;;  %v1334_v15 = vld [vmem:[%s2224_s10] ss:$0 sm:$0xff] }
 0x41a   : > { %v1017_v36 = vpack.c.bf16 %v1016_v35, %v1016_v35 }
 0x41c   : > { %1414 = vmatmul.mubr.msk.bf16.vlgmr.msra.gmra.mrb[12].mxu1 %vm666_vm3, %v903_v32 }
 0x41d   : > { %1424 = vmatpush3.bf16.msra.mxu1 %v1019_v34  ;;  %1425 = vmatprep.mubr.msk.bf16.mxu1 %vm1751_vm0, %v1750_v0 }
 0x424   : > { %1426 = vmatmul.mubr.msk.bf16.vlgmr.msra.gmra.mrb[16].mxu1 %vm666_vm3, %v1017_v36 }
 0x46d   : > { %v720_v37 = vpop.f32.mrb[4].mxu1 }
 0x46e   : > { %726 = vst.msk [vmem:[#allocation2] sm:$0xff] %vm619_vm2, %v720_v37  ;;  %v1391_v38 = vpop.f32.mrb[5].mxu1 }
 0x46f   : > { %v723_v39 = vpop.f32.mrb[6].mxu1 }
 0x470   : > { %v1392_v40 = vpop.f32.mrb[7].mxu1 }
 0x4e7   : > { %v830_v41 = vpop.f32.mrb[8].mxu1 }
 0x4e8   : > { %837 = vrot.lane.b32.xlu0 %v830_v41, %s1759_s3  ;;  %v1403_v42 = vpop.f32.mrb[9].mxu1 }
 0x4e9   : > { %v833_v43 = vpop.f32.mrb[10].mxu1 }
 0x4ea   : > { %v1404_v44 = vpop.f32.mrb[11].mxu1 }
 0x4ef   : > { %v944_v47 = vpop.f32.mrb[12].mxu1 }
 0x4f0   : > { %951 = vrot.lane.b32.xlu1 %v944_v47, %s1760_s13  ;;  %v1415_v48 = vpop.f32.mrb[13].mxu1  ;;  %s1664_s13 = scalar_lea.vmem %s2171_s12, 128 }
 0x4f1   : > { %v947_v49 = vpop.f32.mrb[14].mxu1  ;;  %p1665_p1 = scmp.ne.s32.totalorder %s2171_s12, %s1664_s13 }
 0x4f2   : > { %v1416_v50 = vpop.f32.mrb[15].mxu1 }
 0x4f3   : > { %p1666_p6 = pnand %p1665_p1, %p2262_p13 }
 0x4f5   : > { %p1667_p10 = pneg %p1666_p6 }
 0x4f7   : > { %v1058_v51 = vpop.f32.mrb[16].mxu1 }
 0x4f8   : > { %1065 = vrot.lane.b32.xlu0 %v1058_v51, %s1761_s22  ;;  %v1427_v52 = vpop.f32.mrb[17].mxu1  ;;  %s1670_s22 = scalar_lea.vmem %s1669_s17, 256 }
 0x4f9   : > { %v1061_v53 = vpop.f32.mrb[18].mxu1  ;;  %p1672_p5 = scmp.lt.s32.totalorder %s1670_s22, %s1664_s13 }
 0x4fa   : > { %v1428_v54 = vpop.f32.mrb[19].mxu1 }
 0x4fb   : > { %p1673_p3 = por %p1672_p5, %p1671_p4 }
 0x4fd   : > { %p1674_p7 = pnand %p1673_p3, %p1667_p10 }
 0x55a   : > { %v838_v55 = vpop.permute.xlu0 %837 }
 0x55b   : > { %841 = vst.msk [vmem:[#allocation2] sm:$0xff] %vm840_vm4, %v838_v55 }
 0x562   : > { %v952_v56 = vpop.permute.xlu1 %951 }
 0x563   : > { %955 = vst.msk [vmem:[#allocation2] sm:$0xff] %vm954_vm5, %v952_v56 }
 0x56a   : > { %v1066_v0 = vpop.permute.xlu0 %1065 }
 0x56b   : > { %1069 = vst.msk [vmem:[#allocation2] sm:$0xff] %vm1068_vm6, %v1066_v0 }
 0x572   : > { %v1070_v57 = vld [vmem:[#allocation2] sm:$0xff] }
 0x573   : > { %v1071_v58 = vpack.c.bf16 %v1070_v57, %v1070_v57 }
 0x575   : > { %1434 = vmatmul.mubr.msk.bf16.vlgmr.msra.gmra.mrb[20].mxu0 %vm501_vm1, %v1071_v58 }
 0x648   : > { %v1132_v60 = vpop.f32.mrb[20].mxu0 }
 0x649   : > { %v1133_v61 = vadd.f32 %v1329_v59, %v1132_v60  ;;  %v1435_v62 = vpop.f32.mrb[21].mxu0 }
 0x64a   : > { %v1135_v63 = vpop.f32.mrb[22].mxu0 }
 0x64b   : > { %v1436_v1 = vpop.f32.mrb[23].mxu0  ;;  %v1138_v2 = vadd.f32 %v1133_v61, %v2071_v6  ;;  %v1333_v6 = vld [vmem:[%s2223_s9] ss:$0 sm:$0xff] }
 0x64d   : > { %v1139_v3 = vsel %vm501_vm1, %v1138_v2, 0.0 }
 0x64e   : > { %1140 = vadd.xlane.f32.xlu1 %v1139_v3 }
 0x6db   : > { %v1141_v4 = vpop.xlane.xlu1 %1140 }
 0x6dc   : > { %v1143_v5 = vmul.f32 0.03125, %v1141_v4 }
 0x6de   : > { %v1144_v7 = vsub.f32 %v1138_v2, %v1143_v5 }
 0x6e0   : > { %v1145_v8 = vmul.f32 %v1144_v7, %v1144_v7 }
 0x6e2   : > { %v1146_v9 = vsel %vm501_vm1, %v1145_v8, 0.0 }
 0x6e3   : > { %1147 = vadd.xlane.f32.xlu0 %v1146_v9 }
 0x770   : > { %v1148_v10 = vpop.xlane.xlu0 %1147 }
 0x771   : > { %v1149_v11 = vmul.f32 0.03125, %v1148_v10 }
 0x773   : > { %v1150_v12 = vadd.f32 1e-05, %v1149_v11 }
 0x775   : > { %1546 = vrsqrt.f32 %v1150_v12 }
 0x77f   : > { %v1547_v13 = vpop.eup %1546 }
 0x780   : > { %v1152_v14 = vmul.f32 %v1547_v13, %v1144_v7 }
 0x782   : > { %v1160_v16 = vmul.f32 %v1333_v6, %v1152_v14 }
 0x784   : > { %v1168_v17 = vadd.f32 %v1334_v15, %v1160_v16 }
 0x786   : > { %1169 = vst.msk [vmem:[%s470_s28] sm:$0xff] %vm501_vm1, %v1168_v17 }
 0x787   : > { %1677 = shalt.err (!%p1674_p7)
}
 0x788   : > { %s1678_s27 = scalar_lea.hbm %s2169_s23, 128  ;;  %s1682_s11 = scalar_lea.hbm %s2261_s29, 256 }
 0x789   : > { %p1679_p9 = scmp.ne.s32.totalorder %s2169_s23, %s1678_s27  ;;  %p1683_p11 = scmp.lt.u32.totalorder %s2169_s23, %s2261_s29 }
 0x78a   : > { %p1684_p2 = scmp.lt.u32.totalorder %s1682_s11, %s1678_s27  ;;  %p1686_p1 = scmp.lt.u32.totalorder %s1678_s27, %s2169_s23 }
 0x78b   : > { %p1680_p0 = pnand %p1679_p9, %p2262_p13 }
 0x78c   : > { %p1685_p12 = por %p1684_p2, %p1683_p11 }
 0x78d   : > { %p1681_p8 = pneg %p1680_p0 }
 0x78e   : > { %p1687_p6 = por %p1686_p1, %p1685_p12 }
 0x790   : > { %p1688_p10 = pnand %p1687_p6, %p1681_p8 }
 0x792   : > { %1691 = shalt.err (!%p1688_p10)
}
 0x793   : > { %1449 = dma.vmem_to_hbm [thread:$0]  (%p2262_p13), %s2171_s12, 128, %s2169_s23, %s1171_s30  }
 0x794 PF: > { %s2263_s24 = sld [smem:[#allocation17_spill]]  ;;  %s2264_s16 = sld [smem:[#allocation19_spill]] }
 0x795   : > { %p2266_p5 = scmp.ge.s32.totalorder %s1742_s20, 2 }
 0x79a   : > { %s1196_s28 = sand.u32 1, %s2263_s24   ;;  %p2265_p4 = scmp.ne.s32.totalorder %s2264_s16, 0 }
 0x79b   : > { %s1197_s3 = scalar_lea.sflag [#allocation5], %s1196_s28 }
 0x79c   : > { %p1466_p3 = pnand %p2266_p5, %p2265_p4 }
 0x79e   : > { %1725 = dma.done.wait (!%p1466_p3), %s1197_s3, 128  }
 0x79f   : > { %1727 = vsyncadd (!%p1466_p3), %s1197_s3, 4294967168  ;;  %s2267_s20 = sld [smem:[#allocation20_spill]]  ;;  %s2268_s25 = sld [smem:[#allocation18_spill]] }
 0x7a0   : > { %s2269_s19 = sld [smem:[#allocation21_spill]]  ;;  %s2270_s17 = smov %s1734_s18 }
 0x7a5   : > { %p28_p7 = scmp.ge.s32.totalorder %s2267_s20, 4   ;;  %s2271_s18 = smov %s2268_s25 }
 0x7a7   :  { %30 = sbr.rel (!%p28_p7) target bundleno = 12 (0xc), region = 130 }
 0x7ae   :  { %1202 = vsyncpa [#allocation4], 1 }
 0x7af   :  { %1204 = vsyncpa [#allocation4 + $0x1], 1 }
 0x7b0   :  { %1205 = vsyncpa [#allocation7], 1 }
 0x7b1   :  { %1207 = vsyncpa [#allocation7 + $0x1], 1 }
 0x7b2   :  { %1208 = vsyncpa [#allocation10], 1 }
 0x7b3   :  { %1209 = vsyncpa [#allocation5], 1 }
 0x7b4   :  { %1211 = vsyncpa [#allocation5 + $0x1], 1 }

// kernel: tpu_custom_call.1
= control target key start
LH: loop header
LB: loop body
LE: loop exit
PB: predicated region body
PF: predicated region fallthrough
CT: control target
= control target key end

     0   :  { %s2214_s0 = inlined_call_operand.hbm [shape: f32[2,8,32], index: 0, kind: input, shape index: {}]   ;;  %s2215_s1 = inlined_call_operand.hbm [shape: bf16[2,16,32], index: 1, kind: input, shape index: {}]   ;;  %s2216_s2 = inlined_call_operand.vmem [shape: bf16[8,16], index: 2, kind: input, shape index: {}]   ;;  %s2217_s3 = inlined_call_operand.hbm [shape: bf16[32,32], index: 3, kind: input, shape index: {}]   ;;  %s2218_s4 = inlined_call_operand.hbm [shape: bf16[32,64], index: 4, kind: input, shape index: {}]   ;;  %s2219_s5 = inlined_call_operand.vmem [shape: f32[1,32], index: 5, kind: input, shape index: {}]   ;;  %s2220_s6 = inlined_call_operand.vmem [shape: f32[1,64], index: 6, kind: input, shape index: {}]   ;;  %s2221_s7 = inlined_call_operand.vmem [shape: bf16[32,32], index: 7, kind: input, shape index: {}]   ;;  %s2222_s8 = inlined_call_operand.vmem [shape: f32[1,32], index: 8, kind: input, shape index: {}]   ;;  %s2223_s9 = inlined_call_operand.vmem [shape: f32[1,32], index: 9, kind: input, shape index: {}]   ;;  %s2224_s10 = inlined_call_operand.vmem [shape: f32[1,32], index: 10, kind: input, shape index: {}]   ;;  %s2225_s11 = inlined_call_operand.hbm [shape: f32[2,8,32], index: 11, kind: output, shape index: {}]  }
   0x1   :  { %2237 = sst [smem:[#allocation22_spill]] %s2217_s3 }
   0x2   :  { %2238 = sst [smem:[#allocation23_spill]] %s2218_s4 }
   0x3   :  { %2239 = sst [smem:[#allocation24_spill]] %s2225_s11 }
   0x4   :  { %16 = vsyncpa [#allocation4], 0 }
   0x5   :  { %18 = vsyncpa [#allocation4 + $0x1], 0 }
   0x6   :  { %19 = vsyncpa [#allocation7], 0 }
   0x7   :  { %21 = vsyncpa [#allocation7 + $0x1], 0 }
   0x8   :  { %22 = vsyncpa [#allocation10], 0 }
   0x9   :  { %23 = vsyncpa [#allocation5], 0 }
   0xa   :  { %25 = vsyncpa [#allocation5 + $0x1], 0  ;;  %s1823_s17 = smov 0   ;;  %s1825_s18 = smov 0  }
   0xb   :  { %s1827_s19 = smov 0   ;;  %s1829_s20 = smov 0  }
   0xc LB: > { %2240 = sst [smem:[#allocation17_spill]] %s1730_s17  ;;  %s1844_s21 = sadd.s32 4294967295, %s1742_s20   ;;  %s1742_s20 = sphi %s1829_s20, %s2267_s20   ;;  %s1738_s19 = sphi %s1827_s19, %s2269_s19   ;;  %s1734_s18 = sphi %s1825_s18, %s2271_s18   ;;  %s1730_s17 = sphi %s1823_s17, %s2270_s17  }
   0xd   : > { %2241 = sst [smem:[#allocation18_spill]] %s1738_s19  ;;  %s1296_s22 = sadd.s32 4294967294, %s1742_s20  }
   0xe   : > { %p51_p0 = scmp.ne.s32.totalorder %s1734_s18, %s1730_s17  ;;  %p2226_p1 = scmp.eq.s32.totalorder %s1844_s21, 0 }
   0xf   : > { %p296_p3 = scmp.eq.s32.totalorder %s1296_s22, 1  ;;  %p1297_p5 = scmp.ge.s32.totalorder %s1742_s20, 1 }
  0x10   : > { %p1853_p4 = por %p2226_p1, %p51_p0  ;;  %p303_p7 = scmp.lt.s32.totalorder %s1742_s20, 3 }
  0x11   : > { %p1858_p6 = por %p296_p3, %p51_p0  ;;  %s1744_s26 = smov [#allocation8]  }
  0x12   : > { %s2242_s23 = scalar_select %p1853_p4, 1, 0 }
  0x13   : > { %s2243_s24 = scalar_select %p1858_p6, 1, 0 }
  0x14   : > { %p1863_p8 = pnand %p1297_p5, %p303_p7  ;;  %s318_s27 = sshll.u32 %s1744_s26, 4  ;;  %s1867_s27 = int_to_ptr.vmem [resolvable:$true] %s318_s27 }
  0x15   : > { %2244 = sst [smem:[#allocation19_spill]] %s2243_s24  ;;  %s1745_s29 = smov [#allocation9]  }
  0x16   : > { %p1451_p9 = pneg %p1863_p8  ;;  %s331_s30 = sshll.u32 %s1745_s29, 4  ;;  %s1878_s30 = int_to_ptr.vmem [resolvable:$true] %s331_s30 }
  0x17   : > { %s2247_s3 = sld [smem:[#allocation22_spill]] }
  0x18   : > { %p1874_p11 = pnand %p1451_p9, %p2226_p1 }
  0x1a   : > { %p1550_p13 = pneg %p1874_p11 }
  0x1d   : > { %s1548_s14 = scalar_lea.hbm %s2247_s3, 256 }
  0x1e   : > { %p1549_p12 = scmp.ne.s32.totalorder %s2247_s3, %s1548_s14  ;;  %p1555_p5 = scmp.lt.u32.totalorder %s1548_s14, %s2247_s3 }
  0x20   : > { %p1551_p0 = pnand %p1550_p13, %p1549_p12 }
  0x22   : > { %p1552_p3 = pneg %p1551_p0 }
  0x24   : > { %p1557_p7 = pnand %p1555_p5, %p1552_p3 }
  0x26   : > { %1560 = shalt.err (!%p1557_p7)
}
  0x27   : > { %s1561_s29 = scalar_lea.vmem %s1867_s27, 256  ;;  %p1569_p2 = scmp.lt.s32.totalorder %s1867_s27, %s1867_s27 }
  0x28   : > { %p1562_p9 = scmp.ne.s32.totalorder %s1867_s27, %s1561_s29  ;;  %p1570_p12 = scmp.lt.s32.totalorder %s1561_s29, %s1561_s29 }
  0x2a   : > { %p1564_p10 = pnand %p1562_p9, %p1550_p13  ;;  %p1571_p0 = por %p1570_p12, %p1569_p2 }
  0x2c   : > { %p1565_p1 = pneg %p1564_p10 }
  0x2e   : > { %p1572_p6 = pnand %p1571_p0, %p1565_p1 }
  0x30   : > { %1575 = shalt.err (!%p1572_p6)
}
  0x31   : > { %s2230_s12 = smov 64   ;;  %s2231_s13 = smov 4  }
  0x32   : > { %1454 = dma.hbm_to_vmem [thread:$0]  (!%p1874_p11), %s2247_s3, 256, %s1867_s27, [#allocation7], %s2230_s12, %s2230_s12, %s2231_s13  }
  0x33   : > { %s2248_s4 = sld [smem:[#allocation23_spill]] }
  0x39   : > { %s1576_s26 = scalar_lea.hbm %s2248_s4, 256 }
  0x3a   : > { %p1577_p1 = scmp.ne.s32.totalorder %s2248_s4, %s1576_s26  ;;  %p1583_p10 = scmp.lt.u32.totalorder %s1576_s26, %s2248_s4 }
  0x3c   : > { %p1579_p2 = pnand %p1577_p1, %p1550_p13 }
  0x3e   : > { %p1580_p6 = pneg %p1579_p2 }
  0x40   : > { %p1585_p3 = pnand %p1583_p10, %p1580_p6 }
  0x42   : > { %1588 = shalt.err (!%p1585_p3)
}
  0x43   : > { %s1589_s27 = scalar_lea.vmem %s1878_s30, 256  ;;  %p1597_p12 = scmp.lt.s32.totalorder %s1878_s30, %s1878_s30 }
  0x44   : > { %p1590_p5 = scmp.ne.s32.totalorder %s1878_s30, %s1589_s27  ;;  %p1598_p0 = scmp.lt.s32.totalorder %s1589_s27, %s1589_s27 }
  0x46   : > { %p1592_p7 = pnand %p1590_p5, %p1550_p13  ;;  %p1599_p1 = por %p1598_p0, %p1597_p12 }
  0x48   : > { %p1593_p9 = pneg %p1592_p7 }
  0x4a   : > { %p1600_p2 = pnand %p1599_p1, %p1593_p9 }
  0x4c   : > { %1603 = shalt.err (!%p1600_p2)
}
  0x4d   : > { %1457 = dma.hbm_to_vmem [thread:$0]  (!%p1874_p11), %s2248_s4, 256, %s1878_s30, [#allocation10], %s2230_s12, %s2230_s12, %s2231_s13  }
  0x4e   : > { %s1939_s24 = sadd.s32 1, %s1742_s20   ;;  %s38_s28 = sadd.s32 1, %s1738_s19 }
  0x4f   : > { %2249 = sst [smem:[#allocation20_spill]] %s1939_s24  ;;  %s35_s14 = ssub.s32 %s1742_s20, %s1939_s24 }
  0x50   : > { %p45_p13 = scmp.ne.s32.totalorder %s1738_s19, %s1734_s18  ;;  %p36_p6 = scmp.eq.s32.totalorder %s35_s14, 0 }
  0x51   : > { %p46_p10 = scmp.eq.s32.totalorder %s1742_s20, 0  ;;  %p2250_p3 = scmp.eq.s32.totalorder %s1844_s21, 1 }
  0x52   : > { %p1471_p7 = scmp.lt.s32.totalorder %s1742_s20, 2  ;;  %s363_s22 = sand.u32 1, %s1738_s19  }
  0x53   : > { %p1949_p5 = por %p2250_p3, %p45_p13  ;;  %p47_p9 = por %p46_p10, %p45_p13 }
  0x54   : > { %s1955_s16 = scalar_select %p36_p6, %s1738_s19, %s38_s28  }
  0x55   : > { %s2251_s15 = scalar_select %p1949_p5, 1, 0 }
  0x56   : > { %2252 = sst [smem:[#allocation21_spill]] %s1955_s16  ;;  %s1301_s26 = sshll.u32 %s363_s22, 3 }
  0x57   : > { %s1302_s30 = sshll.u32 %s1742_s20, 7  ;;  %s367_s17 = scalar_lea.vmem [#allocation3], %s1301_s26 }
  0x58   : > { %s1962_s11 = scalar_lea.hbm %s2214_s0, %s1302_s30  ;;  %s374_s14 = sshll.u32 %s367_s17, 4  ;;  %s1964_s14 = int_to_ptr.vmem [resolvable:$true] %s374_s14 }
  0x59   : > { %p1966_p11 = pnand %p1471_p7, %p47_p9  ;;  %s1973_s29 = scalar_lea.hbm %s2215_s1, %s1302_s30 }
  0x5a   : > { %s385_s27 = scalar_lea.vmem [#allocation6], %s1301_s26  ;;  %s364_s4 = scalar_lea.sflag [#allocation4], %s363_s22 }
  0x5b   : > { %s1975_s3 = sshll.u32 %s385_s27, 4  ;;  %s1604_s16 = scalar_lea.hbm %s1962_s11, 128  ;;  %s2003_s3 = int_to_ptr.vmem [resolvable:$true] %s1975_s3 }
  0x5c   : > { %p1605_p12 = scmp.ne.s32.totalorder %s1962_s11, %s1604_s16  ;;  %p1606_p0 = pneg %p1966_p11 }
  0x5d   : > { %s1609_s12 = scalar_lea.hbm %s2214_s0, 256  ;;  %p1610_p13 = scmp.lt.u32.totalorder %s1962_s11, %s2214_s0 }
  0x5e   : > { %p1607_p1 = pnand %p1606_p0, %p1605_p12  ;;  %p1611_p6 = scmp.lt.u32.totalorder %s1609_s12, %s1604_s16 }
  0x5f   : > { %p1613_p3 = scmp.lt.u32.totalorder %s1604_s16, %s1962_s11 }
  0x60   : > { %p1608_p2 = pneg %p1607_p1  ;;  %p1612_p10 = por %p1611_p6, %p1610_p13 }
  0x62   : > { %p1614_p7 = por %p1613_p3, %p1612_p10 }
  0x64   : > { %p1615_p9 = pnand %p1614_p7, %p1608_p2 }
  0x66   : > { %1618 = shalt.err (!%p1615_p9)
}
  0x67   : > { %s1619_s22 = scalar_lea.vmem %s1964_s14, 128  ;;  %s1748_s19 = smov [#allocation3]  }
  0x68   : > { %p1620_p12 = scmp.ne.s32.totalorder %s1964_s14, %s1619_s22  ;;  %s1624_s26 = sshll.u32 %s1748_s19, 4  ;;  %s1625_s26 = int_to_ptr.vmem [resolvable:$false] %s1624_s26 }
  0x69   : > { %s1626_s24 = scalar_lea.vmem %s1625_s26, 256  ;;  %p1627_p4 = scmp.lt.s32.totalorder %s1964_s14, %s1625_s26 }
  0x6a   : > { %p1622_p1 = pnand %p1620_p12, %p1606_p0  ;;  %p1628_p13 = scmp.lt.s32.totalorder %s1626_s24, %s1619_s22 }
  0x6c   : > { %p1623_p5 = pneg %p1622_p1  ;;  %p1629_p6 = por %p1628_p13, %p1627_p4 }
  0x6e   : > { %p1630_p10 = pnand %p1629_p6, %p1623_p5 }
  0x70   : > { %1633 = shalt.err (!%p1630_p10)
}
  0x71   : > { %1461 = dma.hbm_to_vmem [thread:$0]  (!%p1966_p11), %s1962_s11, 128, %s1964_s14, %s364_s4  }
  0x72   : > { %s381_s16 = sand.u32 1, %s1742_s20   ;;  %s1634_s27 = scalar_lea.hbm %s1973_s29, 128 }
  0x73   : > { %s2006_s30 = scalar_lea.sflag [#allocation7], %s381_s16  ;;  %p1635_p4 = scmp.ne.s32.totalorder %s1973_s29, %s1634_s27 }
  0x74   : > { %s1639_s13 = scalar_lea.hbm %s2215_s1, 256  ;;  %p1640_p3 = scmp.lt.u32.totalorder %s1973_s29, %s2215_s1 }
  0x75   : > { %p1637_p5 = pnand %p1635_p4, %p1606_p0  ;;  %p1641_p7 = scmp.lt.u32.totalorder %s1639_s13, %s1634_s27 }
  0x76   : > { %p1643_p12 = scmp.lt.u32.totalorder %s1634_s27, %s1973_s29 }
  0x77   : > { %p1638_p2 = pneg %p1637_p5  ;;  %p1642_p9 = por %p1641_p7, %p1640_p3 }
  0x79   : > { %p1644_p1 = por %p1643_p12, %p1642_p9 }
  0x7b   : > { %p1645_p13 = pnand %p1644_p1, %p1638_p2 }
  0x7d   : > { %1648 = shalt.err (!%p1645_p13)
}
  0x7e   : > { %s1649_s4 = scalar_lea.vmem %s2003_s3, 128  ;;  %s1749_s11 = smov [#allocation6]  }
  0x7f   : > { %p1650_p6 = scmp.ne.s32.totalorder %s2003_s3, %s1649_s4  ;;  %s1654_s14 = sshll.u32 %s1749_s11, 4  ;;  %s1655_s14 = int_to_ptr.vmem [resolvable:$false] %s1654_s14 }
  0x80   : > { %s1656_s26 = scalar_lea.vmem %s1655_s14, 256  ;;  %p1657_p5 = scmp.lt.s32.totalorder %s2003_s3, %s1655_s14 }
  0x81   : > { %p1652_p10 = pnand %p1650_p6, %p1606_p0  ;;  %p1658_p3 = scmp.lt.s32.totalorder %s1656_s26, %s1649_s4 }
  0x83   : > { %p1653_p4 = pneg %p1652_p10  ;;  %p1659_p7 = por %p1658_p3, %p1657_p5 }
  0x85   : > { %p1660_p9 = pnand %p1659_p7, %p1653_p4 }
  0x87   : > { %1663 = shalt.err (!%p1660_p9)
}
  0x88   : > { %s2254_s24 = smov 4   ;;  %s2255_s16 = smov 64  }
  0x89   : > { %1464 = dma.hbm_to_vmem [thread:$0]  (!%p1966_p11), %s1973_s29, 128, %s2003_s3, %s2006_s30, %s2255_s16, %s2255_s16, %s2254_s24  }
  0x8a   : > { %404 = sbr.rel (%p1863_p8) target bundleno = 1940 (0x794), region = 64  ;;  %s2038_s27 = sand.u32 (!%p1863_p8), 1, %s1734_s18  }
  0x8b   : > { %s2041_s17 = sshll.u32 (!%p1863_p8), %s2038_s27, 3  ;;  %s407_s28 = scalar_lea.sflag (!%p1863_p8), [#allocation4], %s2038_s27 }
  0x8c   : > { %s410_s12 = scalar_lea.vmem (!%p1863_p8), [#allocation3], %s2041_s17  ;;  %p2256_p0 = scmp.ne.s32.totalorder (!%p1863_p8), %s2242_s23, 0 }
  0x91   : > { %1709 = dma.done.wait (%p2256_p0), %s407_s28, 128  }
  0x92   : > { %1711 = vsyncadd (%p2256_p0), %s407_s28, 4294967168  ;;  %s415_s3 = sand.u32 1, %s1844_s21   ;;  %s419_s29 = scalar_lea.vmem [#allocation6], %s2041_s17 }
  0x93   : > { %s416_s25 = scalar_lea.sflag [#allocation7], %s415_s3 }
  0x94   : > { %1713 = dma.done.wait (%p2256_p0), %s416_s25, 128  }
  0x95   : > { %1715 = vsyncadd (%p2256_p0), %s416_s25, 4294967168  ;;  %p2257_p8 = scmp.eq.s32.totalorder %s1844_s21, 0 }
  0x97   : > { %1717 = dma.done.wait (%p2257_p8), [#allocation7], 256   ;;  %p2258_p11 = pmov %p2257_p8 }
  0x98   : > { %p2259_p2 = pmov %p2257_p8 }
  0x99   : > { %1719 = vsyncadd (%p2258_p11), [#allocation7], 4294967040 }
  0x9a   : > { %1721 = dma.done.wait (%p2259_p2), [#allocation10], 256   ;;  %p2260_p12 = pmov %p2259_p2 }
  0x9b   : > { %v1750_v0 = vmov 0.0   ;;  %vm1751_vm0 = vmmov 0   ;;  %v1523_v1 = vld [vmem:[#allocation9] sm:$0xff]   ;;  %v1524_v2 = vld [vmem:[#allocation9 + $0x8] sm:$0xff]   ;;  %v1525_v3 = vld [vmem:[#allocation8] sm:$0xff]   ;;  %vm501_vm1 = vcmask 261120  }
  0x9c   : > { %1723 = vsyncadd (%p2260_p12), [#allocation10], 4294967040  ;;  %1373 = vmatprep.subr.bf16.mxu1 %v1750_v0  ;;  %1365 = vmatprep.subr.bf16.mxu0 %v1750_v0  ;;  %v1527_v4 = vld [vmem:[#allocation8 + $0x8] sm:$0xff]   ;;  %v1526_v5 = vld [vmem:[%s419_s29] sm:$0xff]   ;;  %vm619_vm2 = vcmask 64512   ;;  %s1752_s19 = smov 112  }
  0x9d   : > { %1377 = vmatprep.mubr.msk.bf16.mxu1 %vm1751_vm0, %v1750_v0  ;;  %1369 = vmatprep.mubr.msk.bf16.mxu0 %vm1751_vm0, %v1750_v0  ;;  %v2071_v6 = vld [vmem:[%s410_s12] sm:$0xff]  ;;  %v1316_v8 = vld [vmem:[%s2220_s6] ss:$0 sm:$0xff]  ;;  %s1753_s4 = smov 120   ;;  %s1754_s11 = smov 104   ;;  %vm666_vm3 = vcmask 130048  }
  0x9e   : > { %1374 = vmatpush3.bf16.msra.mxu1 %v1523_v1  ;;  %1366 = vmatpush3.bf16.msra.mxu0 %v1525_v3  ;;  %v473_v7 = vpack.c.bf16 %v2071_v6, %v2071_v6  ;;  %v1312_v10 = vld [vmem:[%s2219_s5] ss:$0 sm:$0xff]  ;;  %s1755_s24 = smov 96   ;;  %s1756_s16 = smov 80   ;;  %vm840_vm4 = vcmask 130112   ;;  %vm954_vm5 = vcmask 195712  }
  0x9f   : > { %1375 = vmatprep.subr.bf16.mxu1 %v1750_v0  ;;  %1367 = vmatprep.subr.bf16.mxu0 %v1750_v0  ;;  %v476_v33 = vld [vmem:[%s2216_s2] sm:$0xf]  ;;  %s1757_s28 = smov 72   ;;  %s1758_s12 = smov 88   ;;  %vm1068_vm6 = vcmask 261312  }
  0xa0   : > { %v477_v34 = vunpack.c.l.bf16 %v476_v33  ;;  %s1759_s3 = smov 8   ;;  %s1760_s13 = smov 16  }
  0xa1   : > { %s1761_s22 = smov 24   ;;  %s2261_s29 = sld [smem:[#allocation24_spill]] }
  0xa2   : > { %1376 = vmatpush3.bf16.msra.mxu1 %v1524_v2  ;;  %1368 = vmatpush3.bf16.msra.mxu0 %v1527_v4  ;;  %s1171_s30 = scalar_lea.sflag [#allocation5], %s2038_s27  ;;  %p2262_p13 = scmp.ne.s32.totalorder %s2251_s15, 0 }
  0xa3   : > { %1387 = vmatprep.subr.bf16.mxu1 %v1750_v0  ;;  %1381 = vmatprep.subr.bf16.mxu0 %v1750_v0 }
  0xa5   : > { %1378 = vmatmul.mubr.msk.bf16.vlgmr.msra.gmra.mrb[0].mxu1 %vm501_vm1, %v1526_v5  ;;  %1370 = vmatmul.mubr.msk.bf16.vlgmr.msra.gmra.mrb[0].mxu0 %vm501_vm1, %v473_v7 }
  0xa6   : > { %1389 = vmatprep.mubr.msk.bf16.mxu1 %vm1751_vm0, %v1750_v0  ;;  %1383 = vmatprep.mubr.msk.bf16.mxu0 %vm1751_vm0, %v1750_v0 }
 0x178   : > { %v610_v9 = vpop.f32.mrb[0].mxu1  ;;  %v539_v13 = vpop.f32.mrb[0].mxu0 }
 0x179   : > { %v1379_v11 = vpop.f32.mrb[1].mxu1  ;;  %v611_v14 = vadd.f32 %v1316_v8, %v610_v9  ;;  %v540_v17 = vadd.f32 %v1312_v10, %v539_v13  ;;  %v1371_v18 = vpop.f32.mrb[1].mxu0 }
 0x17a   : > { %v613_v12 = vpop.f32.mrb[2].mxu1  ;;  %v542_v19 = vpop.f32.mrb[2].mxu0 }
 0x17b   : > { %v614_v15 = vadd.f32 %v1316_v8, %v613_v12  ;;  %v1380_v16 = vpop.f32.mrb[3].mxu1  ;;  %v1372_v21 = vpop.f32.mrb[3].mxu0  ;;  %v617_v22 = vpack.c.bf16 %v540_v17, %v540_v17 }
 0x17d   : > { %v2089_v20 = vpack.c.bf16 %v614_v15, %v611_v14 }
 0x17f   : > { %844 = vrot.lane.b32.xlu1 %v2089_v20, %s1752_s19  ;;  %730 = vrot.lane.b32.xlu0 %v2089_v20, %s1753_s4  ;;  %v624_v23 = vsel %vm619_vm2, %v2089_v20, 0 }
 0x180   : > { %1382 = vmatpush3.bf16.xpose.msra.mxu0 %v624_v23 }
 0x181   : > { %1393 = vmatprep.subr.bf16.mxu0 %v1750_v0 }
 0x183   : > { %842 = vrot.lane.b32.xlu1 %v617_v22, %s1752_s19  ;;  %728 = vrot.lane.b32.xlu0 %v617_v22, %s1753_s4 }
 0x187   : > { %956 = vrot.lane.b32.xlu1 %v617_v22, %s1754_s11  ;;  %958 = vrot.lane.b32.xlu0 %v2089_v20, %s1754_s11 }
 0x188   : > { %1384 = vmatmul.mubr.msk.bf16.vlgmr.msra.gmra.mrb[4].mxu0 %vm619_vm2, %v617_v22 }
 0x189   : > { %1395 = vmatprep.mubr.msk.bf16.mxu0 %vm1751_vm0, %v1750_v0 }
 0x1f1   : > { %v731_v24 = vpop.permute.xlu0 %730  ;;  %v845_v26 = vpop.permute.xlu1 %844 }
 0x1f2   : > { %v736_v25 = vsel %vm619_vm2, %v731_v24, 0  ;;  %v850_v28 = vsel %vm619_vm2, %v845_v26, 0 }
 0x1f3   : > { %1394 = vmatpush3.bf16.xpose.msra.mxu0 %v736_v25 }
 0x1f4   : > { %1405 = vmatprep.subr.bf16.mxu0 %v1750_v0 }
 0x1f5   : > { %v729_v27 = vpop.permute.xlu0 %728  ;;  %v843_v30 = vpop.permute.xlu1 %842 }
 0x1f9   : > { %v959_v29 = vpop.permute.xlu0 %958  ;;  %v957_v32 = vpop.permute.xlu1 %956 }
 0x1fa   : > { %1396 = vmatmul.mubr.msk.bf16.vlgmr.msra.gmra.mrb[8].mxu0 %vm619_vm2, %v729_v27  ;;  %v964_v31 = vsel %vm619_vm2, %v959_v29, 0 }
 0x1fb   : > { %1406 = vmatpush3.bf16.xpose.msra.mxu0 %v850_v28  ;;  %1407 = vmatprep.mubr.msk.bf16.mxu0 %vm1751_vm0, %v1750_v0 }
 0x1fc   : > { %1417 = vmatprep.subr.bf16.mxu0 %v1750_v0 }
 0x202   : > { %1408 = vmatmul.mubr.msk.bf16.vlgmr.msra.gmra.mrb[12].mxu0 %vm619_vm2, %v843_v30 }
 0x203   : > { %1418 = vmatpush3.bf16.xpose.msra.mxu0 %v964_v31  ;;  %1419 = vmatprep.mubr.msk.bf16.mxu0 %vm1751_vm0, %v1750_v0 }
 0x204   : > { %1429 = vmatprep.subr.bf16.mxu0 %v1750_v0 }
 0x20a   : > { %1420 = vmatmul.mubr.msk.bf16.vlgmr.msra.gmra.mrb[16].mxu0 %vm619_vm2, %v957_v32 }
 0x20b   : > { %1433 = vmatprep.mubr.msk.bf16.mxu0 %vm1751_vm0, %v1750_v0 }
 0x25b   : > { %v660_v35 = vpop.f32.mrb[4].mxu0 }
 0x25c   : > { %v661_v36 = vadd.f32 %v660_v35, %v477_v34  ;;  %v1385_v37 = vpop.f32.mrb[5].mxu0 }
 0x25d   : > { %v663_v38 = vpop.f32.mrb[6].mxu0 }
 0x25e   : > { %v1386_v39 = vpop.f32.mrb[7].mxu0  ;;  %v667_v40 = vsel %vm666_vm3, %v661_v36, -inf }
 0x25f   : > { %668 = vmax.xlane.f32.xlu0 %v667_v40 }
 0x2cd   : > { %v772_v41 = vpop.f32.mrb[8].mxu0 }
 0x2ce   : > { %v773_v42 = vadd.f32 %v772_v41, %v477_v34  ;;  %v1397_v43 = vpop.f32.mrb[9].mxu0 }
 0x2cf   : > { %v775_v44 = vpop.f32.mrb[10].mxu0 }
 0x2d0   : > { %v1398_v45 = vpop.f32.mrb[11].mxu0  ;;  %v778_v46 = vsel %vm666_vm3, %v773_v42, -inf }
 0x2d1   : > { %779 = vmax.xlane.f32.xlu1 %v778_v46  ;;  %v1528_v45 = vld [vmem:[%s2221_s7] sm:$0xff]   ;;  %v1529_v46 = vld [vmem:[%s2221_s7 + $0x8] sm:$0xff]  }
 0x2d2   : > { %1430 = vmatpush3.bf16.msra.mxu0 %v1528_v45 }
 0x2d3   : > { %1431 = vmatprep.subr.bf16.mxu0 %v1750_v0 }
 0x2d5   : > { %v886_v47 = vpop.f32.mrb[12].mxu0 }
 0x2d6   : > { %v887_v48 = vadd.f32 %v886_v47, %v477_v34  ;;  %v1409_v49 = vpop.f32.mrb[13].mxu0  ;;  %1432 = vmatpush3.bf16.msra.mxu0 %v1529_v46 }
 0x2d7   : > { %v889_v50 = vpop.f32.mrb[14].mxu0 }
 0x2d8   : > { %v1410_v51 = vpop.f32.mrb[15].mxu0  ;;  %v892_v52 = vsel %vm666_vm3, %v887_v48, -inf }
 0x2d9   : > { %893 = vmax.xlane.f32.xlu0 %v892_v52 }
 0x2dd   : > { %v1000_v53 = vpop.f32.mrb[16].mxu0 }
 0x2de   : > { %v1001_v54 = vadd.f32 %v1000_v53, %v477_v34  ;;  %v1421_v55 = vpop.f32.mrb[17].mxu0 }
 0x2df   : > { %v1003_v56 = vpop.f32.mrb[18].mxu0 }
 0x2e0   : > { %v1422_v57 = vpop.f32.mrb[19].mxu0  ;;  %v1006_v58 = vsel %vm666_vm3, %v1001_v54, -inf }
 0x2e1   : > { %1007 = vmax.xlane.f32.xlu0 %v1006_v58 }
 0x2ec   : > { %v669_v59 = vpop.xlane.xlu0 %668 }
 0x2ed   : > { %v670_v60 = vsub.f32 %v661_v36, %v669_v59  ;;  %v1329_v59 = vld [vmem:[%s2222_s8] ss:$0 sm:$0xff] }
 0x2ef   : > { %v671_v61 = vmul.f32 1.442695, %v670_v60 }
 0x2f1   : > { %1530 = vpow2.f32 %v671_v61 }
 0x2fb   : > { %v1531_v62 = vpop.eup %1530 }
 0x2fc   : > { %v673_v63 = vsel %vm666_vm3, %v1531_v62, 0.0 }
 0x2fd   : > { %674 = vadd.xlane.f32.xlu1 %v673_v63 }
 0x30e   : > { %680 = vrot.lane.b32.xlu1 %v2089_v20, %s1755_s24 }
 0x35e   : > { %v780_v1 = vpop.xlane.xlu1 %779 }
 0x35f   : > { %v781_v2 = vsub.f32 %v773_v42, %v780_v1 }
 0x361   : > { %v782_v3 = vmul.f32 1.442695, %v781_v2 }
 0x363   : > { %1532 = vpow2.f32 %v782_v3 }
 0x366   : > { %v894_v4 = vpop.xlane.xlu0 %893 }
 0x367   : > { %v895_v5 = vsub.f32 %v887_v48, %v894_v4 }
 0x369   : > { %v896_v7 = vmul.f32 1.442695, %v895_v5 }
 0x36b   : > { %1534 = vpow2.f32 %v896_v7 }
 0x36d   : > { %v1533_v8 = vpop.eup %1532 }
 0x36e   : > { %v1008_v9 = vpop.xlane.xlu0 %1007  ;;  %v784_v10 = vsel %vm666_vm3, %v1533_v8, 0.0 }
 0x36f   : > { %v1009_v11 = vsub.f32 %v1001_v54, %v1008_v9  ;;  %785 = vadd.xlane.f32.xlu0 %v784_v10 }
 0x371   : > { %v1010_v12 = vmul.f32 1.442695, %v1009_v11 }
 0x373   : > { %1536 = vpow2.f32 %v1010_v12 }
 0x375   : > { %v1535_v13 = vpop.eup %1534 }
 0x376   : > { %v898_v14 = vsel %vm666_vm3, %v1535_v13, 0.0 }
 0x377   : > { %899 = vadd.xlane.f32.xlu1 %v898_v14 }
 0x37d   : > { %v1537_v15 = vpop.eup %1536 }
 0x37e   : > { %v1012_v16 = vsel %vm666_vm3, %v1537_v15, 0.0 }
 0x37f   : > { %1013 = vadd.xlane.f32.xlu0 %v1012_v16 }
 0x388   : > { %904 = vrot.lane.b32.xlu1 %v2089_v20, %s1756_s16  ;;  %s1336_s16 = sshll.u32 %s1844_s21, 7  ;;  %s1762_s21 = smov [#allocation11]  }
 0x389   : > { %s2169_s23 = scalar_lea.hbm %s2261_s29, %s1336_s16 }
 0x38a   : > { %v675_v17 = vpop.xlane.xlu1 %674 }
 0x38b   : > { %1538 = vrcp.f32 %v675_v17 }
 0x38c   : > { %1018 = vrot.lane.b32.xlu1 %v2089_v20, %s1757_s28  ;;  %s470_s28 = scalar_lea.vmem [#allocation11], %s2041_s17  ;;  %s1668_s17 = sshll.u32 %s1762_s21, 4  ;;  %s1669_s17 = int_to_ptr.vmem [resolvable:$false] %s1668_s17 }
 0x38e   : > { %v681_v18 = vpop.permute.xlu1 %680 }
 0x38f   : > { %1388 = vmatpush3.bf16.msra.mxu1 %v681_v18 }
 0x390   : > { %1399 = vmatprep.subr.bf16.mxu1 %v1750_v0 }
 0x395   : > { %v1539_v19 = vpop.eup %1538  ;;  %790 = vrot.lane.b32.xlu0 %v2089_v20, %s1758_s12  ;;  %s1184_s12 = sshll.u32 %s470_s28, 4  ;;  %s2171_s12 = int_to_ptr.vmem [resolvable:$true] %s1184_s12 }
 0x396   : > { %v677_v21 = vmul.f32 %v1539_v19, %v1531_v62  ;;  %p1671_p4 = scmp.lt.s32.totalorder %s2171_s12, %s1669_s17 }
 0x398   : > { %v678_v22 = vpack.c.bf16 %v677_v21, %v677_v21 }
 0x39a   : > { %1390 = vmatmul.mubr.msk.bf16.vlgmr.msra.gmra.mrb[4].mxu1 %vm666_vm3, %v678_v22 }
 0x39b   : > { %1401 = vmatprep.mubr.msk.bf16.mxu1 %vm1751_vm0, %v1750_v0 }
 0x3fc   : > { %v786_v23 = vpop.xlane.xlu0 %785 }
 0x3fd   : > { %1540 = vrcp.f32 %v786_v23 }
 0x404   : > { %v900_v24 = vpop.xlane.xlu1 %899 }
 0x405   : > { %1542 = vrcp.f32 %v900_v24 }
 0x407   : > { %v1541_v25 = vpop.eup %1540 }
 0x408   : > { %v788_v27 = vmul.f32 %v1541_v25, %v1533_v8  ;;  %v905_v30 = vpop.permute.xlu1 %904 }
 0x40a   : > { %v789_v29 = vpack.c.bf16 %v788_v27, %v788_v27 }
 0x40c   : > { %v1014_v26 = vpop.xlane.xlu0 %1013  ;;  %v1019_v34 = vpop.permute.xlu1 %1018 }
 0x40d   : > { %1544 = vrcp.f32 %v1014_v26 }
 0x40f   : > { %v1543_v20 = vpop.eup %1542 }
 0x410   : > { %v791_v28 = vpop.permute.xlu0 %790  ;;  %v902_v31 = vmul.f32 %v1543_v20, %v1535_v13 }
 0x411   : > { %1400 = vmatpush3.bf16.msra.mxu1 %v791_v28 }
 0x412   : > { %1411 = vmatprep.subr.bf16.mxu1 %v1750_v0  ;;  %v903_v32 = vpack.c.bf16 %v902_v31, %v902_v31 }
 0x414   : > { %1402 = vmatmul.mubr.msk.bf16.vlgmr.msra.gmra.mrb[8].mxu1 %vm666_vm3, %v789_v29 }
 0x415   : > { %1412 = vmatpush3.bf16.msra.mxu1 %v905_v30  ;;  %1413 = vmatprep.mubr.msk.bf16.mxu1 %vm1751_vm0, %v1750_v0 }
 0x416   : > { %1423 = vmatprep.subr.bf16.mxu1 %v1750_v0 }
 0x417   : > { %v1545_v33 = vpop.eup %1544 }
 0x418   : > { %v1016_v35 = vmul.f32 %v1545_v33, %v1537_v15  ;;  %v1334_v15 = vld [vmem:[%s2224_s10] ss:$0 sm:$0xff] }
 0x41a   : > { %v1017_v36 = vpack.c.bf16 %v1016_v35, %v1016_v35 }
 0x41c   : > { %1414 = vmatmul.mubr.msk.bf16.vlgmr.msra.gmra.mrb[12].mxu1 %vm666_vm3, %v903_v32 }
 0x41d   : > { %1424 = vmatpush3.bf16.msra.mxu1 %v1019_v34  ;;  %1425 = vmatprep.mubr.msk.bf16.mxu1 %vm1751_vm0, %v1750_v0 }
 0x424   : > { %1426 = vmatmul.mubr.msk.bf16.vlgmr.msra.gmra.mrb[16].mxu1 %vm666_vm3, %v1017_v36 }
 0x46d   : > { %v720_v37 = vpop.f32.mrb[4].mxu1 }
 0x46e   : > { %726 = vst.msk [vmem:[#allocation2] sm:$0xff] %vm619_vm2, %v720_v37  ;;  %v1391_v38 = vpop.f32.mrb[5].mxu1 }
 0x46f   : > { %v723_v39 = vpop.f32.mrb[6].mxu1 }
 0x470   : > { %v1392_v40 = vpop.f32.mrb[7].mxu1 }
 0x4e7   : > { %v830_v41 = vpop.f32.mrb[8].mxu1 }
 0x4e8   : > { %837 = vrot.lane.b32.xlu0 %v830_v41, %s1759_s3  ;;  %v1403_v42 = vpop.f32.mrb[9].mxu1 }
 0x4e9   : > { %v833_v43 = vpop.f32.mrb[10].mxu1 }
 0x4ea   : > { %v1404_v44 = vpop.f32.mrb[11].mxu1 }
 0x4ef   : > { %v944_v47 = vpop.f32.mrb[12].mxu1 }
 0x4f0   : > { %951 = vrot.lane.b32.xlu1 %v944_v47, %s1760_s13  ;;  %v1415_v48 = vpop.f32.mrb[13].mxu1  ;;  %s1664_s13 = scalar_lea.vmem %s2171_s12, 128 }
 0x4f1   : > { %v947_v49 = vpop.f32.mrb[14].mxu1  ;;  %p1665_p1 = scmp.ne.s32.totalorder %s2171_s12, %s1664_s13 }
 0x4f2   : > { %v1416_v50 = vpop.f32.mrb[15].mxu1 }
 0x4f3   : > { %p1666_p6 = pnand %p1665_p1, %p2262_p13 }
 0x4f5   : > { %p1667_p10 = pneg %p1666_p6 }
 0x4f7   : > { %v1058_v51 = vpop.f32.mrb[16].mxu1 }
 0x4f8   : > { %1065 = vrot.lane.b32.xlu0 %v1058_v51, %s1761_s22  ;;  %v1427_v52 = vpop.f32.mrb[17].mxu1  ;;  %s1670_s22 = scalar_lea.vmem %s1669_s17, 256 }
 0x4f9   : > { %v1061_v53 = vpop.f32.mrb[18].mxu1  ;;  %p1672_p5 = scmp.lt.s32.totalorder %s1670_s22, %s1664_s13 }
 0x4fa   : > { %v1428_v54 = vpop.f32.mrb[19].mxu1 }
 0x4fb   : > { %p1673_p3 = por %p1672_p5, %p1671_p4 }
 0x4fd   : > { %p1674_p7 = pnand %p1673_p3, %p1667_p10 }
 0x55a   : > { %v838_v55 = vpop.permute.xlu0 %837 }
 0x55b   : > { %841 = vst.msk [vmem:[#allocation2] sm:$0xff] %vm840_vm4, %v838_v55 }
 0x562   : > { %v952_v56 = vpop.permute.xlu1 %951 }
 0x563   : > { %955 = vst.msk [vmem:[#allocation2] sm:$0xff] %vm954_vm5, %v952_v56 }
 0x56a   : > { %v1066_v0 = vpop.permute.xlu0 %1065 }
 0x56b   : > { %1069 = vst.msk [vmem:[#allocation2] sm:$0xff] %vm1068_vm6, %v1066_v0 }
 0x572   : > { %v1070_v57 = vld [vmem:[#allocation2] sm:$0xff] }
 0x573   : > { %v1071_v58 = vpack.c.bf16 %v1070_v57, %v1070_v57 }
 0x575   : > { %1434 = vmatmul.mubr.msk.bf16.vlgmr.msra.gmra.mrb[20].mxu0 %vm501_vm1, %v1071_v58 }
 0x648   : > { %v1132_v60 = vpop.f32.mrb[20].mxu0 }
 0x649   : > { %v1133_v61 = vadd.f32 %v1329_v59, %v1132_v60  ;;  %v1435_v62 = vpop.f32.mrb[21].mxu0 }
 0x64a   : > { %v1135_v63 = vpop.f32.mrb[22].mxu0 }
 0x64b   : > { %v1436_v1 = vpop.f32.mrb[23].mxu0  ;;  %v1138_v2 = vadd.f32 %v1133_v61, %v2071_v6  ;;  %v1333_v6 = vld [vmem:[%s2223_s9] ss:$0 sm:$0xff] }
 0x64d   : > { %v1139_v3 = vsel %vm501_vm1, %v1138_v2, 0.0 }
 0x64e   : > { %1140 = vadd.xlane.f32.xlu1 %v1139_v3 }
 0x6db   : > { %v1141_v4 = vpop.xlane.xlu1 %1140 }
 0x6dc   : > { %v1143_v5 = vmul.f32 0.03125, %v1141_v4 }
 0x6de   : > { %v1144_v7 = vsub.f32 %v1138_v2, %v1143_v5 }
 0x6e0   : > { %v1145_v8 = vmul.f32 %v1144_v7, %v1144_v7 }
 0x6e2   : > { %v1146_v9 = vsel %vm501_vm1, %v1145_v8, 0.0 }
 0x6e3   : > { %1147 = vadd.xlane.f32.xlu0 %v1146_v9 }
 0x770   : > { %v1148_v10 = vpop.xlane.xlu0 %1147 }
 0x771   : > { %v1149_v11 = vmul.f32 0.03125, %v1148_v10 }
 0x773   : > { %v1150_v12 = vadd.f32 1e-05, %v1149_v11 }
 0x775   : > { %1546 = vrsqrt.f32 %v1150_v12 }
 0x77f   : > { %v1547_v13 = vpop.eup %1546 }
 0x780   : > { %v1152_v14 = vmul.f32 %v1547_v13, %v1144_v7 }
 0x782   : > { %v1160_v16 = vmul.f32 %v1333_v6, %v1152_v14 }
 0x784   : > { %v1168_v17 = vadd.f32 %v1334_v15, %v1160_v16 }
 0x786   : > { %1169 = vst.msk [vmem:[%s470_s28] sm:$0xff] %vm501_vm1, %v1168_v17 }
 0x787   : > { %1677 = shalt.err (!%p1674_p7)
}
 0x788   : > { %s1678_s27 = scalar_lea.hbm %s2169_s23, 128  ;;  %s1682_s11 = scalar_lea.hbm %s2261_s29, 256 }
 0x789   : > { %p1679_p9 = scmp.ne.s32.totalorder %s2169_s23, %s1678_s27  ;;  %p1683_p11 = scmp.lt.u32.totalorder %s2169_s23, %s2261_s29 }
 0x78a   : > { %p1684_p2 = scmp.lt.u32.totalorder %s1682_s11, %s1678_s27  ;;  %p1686_p1 = scmp.lt.u32.totalorder %s1678_s27, %s2169_s23 }
 0x78b   : > { %p1680_p0 = pnand %p1679_p9, %p2262_p13 }
 0x78c   : > { %p1685_p12 = por %p1684_p2, %p1683_p11 }
 0x78d   : > { %p1681_p8 = pneg %p1680_p0 }
 0x78e   : > { %p1687_p6 = por %p1686_p1, %p1685_p12 }
 0x790   : > { %p1688_p10 = pnand %p1687_p6, %p1681_p8 }
 0x792   : > { %1691 = shalt.err (!%p1688_p10)
}
 0x793   : > { %1449 = dma.vmem_to_hbm [thread:$0]  (%p2262_p13), %s2171_s12, 128, %s2169_s23, %s1171_s30  }
 0x794 PF: > { %s2263_s24 = sld [smem:[#allocation17_spill]]  ;;  %s2264_s16 = sld [smem:[#allocation19_spill]] }
 0x795   : > { %p2266_p5 = scmp.ge.s32.totalorder %s1742_s20, 2 }
 0x79a   : > { %s1196_s28 = sand.u32 1, %s2263_s24   ;;  %p2265_p4 = scmp.ne.s32.totalorder %s2264_s16, 0 }
 0x79b   : > { %s1197_s3 = scalar_lea.sflag [#allocation5], %s1196_s28 }
 0x79c   : > { %p1466_p3 = pnand %p2266_p5, %p2265_p4 }
 0x79e   : > { %1725 = dma.done.wait (!%p1466_p3), %s1197_s3, 128  }
 0x79f   : > { %1727 = vsyncadd (!%p1466_p3), %s1197_s3, 4294967168  ;;  %s2267_s20 = sld [smem:[#allocation20_spill]]  ;;  %s2268_s25 = sld [smem:[#allocation18_spill]] }
 0x7a0   : > { %s2269_s19 = sld [smem:[#allocation21_spill]]  ;;  %s2270_s17 = smov %s1734_s18 }
 0x7a5   : > { %p28_p7 = scmp.ge.s32.totalorder %s2267_s20, 4   ;;  %s2271_s18 = smov %s2268_s25 }
 0x7a7   :  { %30 = sbr.rel (!%p28_p7) target bundleno = 12 (0xc), region = 130 }
 0x7ae   :  { %1202 = vsyncpa [#allocation4], 1 }
 0x7af   :  { %1204 = vsyncpa [#allocation4 + $0x1], 1 }
 0x7b0   :  { %1205 = vsyncpa [#allocation7], 1 }
 0x7b1   :  { %1207 = vsyncpa [#allocation7 + $0x1], 1 }
 0x7b2   :  { %1208 = vsyncpa [#allocation10], 1 }
 0x7b3   :  { %1209 = vsyncpa [#allocation5], 1 }
 0x7b4   :  { %1211 = vsyncpa [#allocation5 + $0x1], 1 }

</bundles_post_ra>
